<compile_context>
chip_gen: v7x
topology: tpu7x:2x2x1
jax: 0.10.0
libtpu: 0.0.40
codegen_flags: <defaults>
</compile_context>

<pallas_src>
import jax
import jax.numpy as jnp
from jax.experimental import pallas as pl
from jax.experimental.pallas import tpu as pltpu

BN_EPS = 1e-5
C_IN = 1000     # module feature sizes
C_HID = 1000
C_MID = 100
P_IN = 1024     # lane-padded sizes
P_MID = 128


def _round_up(n, m):
    return -(-n // m) * m


def ahp_kernel(x_ref, vec_ref, w1_ref, w2_ref, out_ref):
    # vec_ref rows: 0 = s1 (BN1 scale), 1 = t1 (BN1 shift), 2 = b1' (fc1 bias w/ BN2
    # folded), 3 = b2' (fc2 bias w/ BN3 folded, first 128 lanes), 4 = w3 row
    # (first 128 lanes), 5 = b3 scalar at [5, 0].
    x = x_ref[...]                                   # (TB, 1024) f32

    s1 = vec_ref[0:1, :]
    t1 = vec_ref[1:2, :]
    b1 = vec_ref[2:3, :]
    b2 = vec_ref[3:4, :P_MID]
    w3 = vec_ref[4:5, :P_MID]
    b3 = vec_ref[5:6, :][:, :1]                      # (1, 1)

    # BN1 (pre-fused scale/shift) + ReLU.  Dropout = identity (eval mode).
    h = jnp.maximum(x * s1 + t1, 0.0)

    # fc1 (+ folded BN2) + ReLU   — bf16 operands, f32 accumulate on the MXU.
    h = jnp.dot(h.astype(jnp.bfloat16), w1_ref[...],
                preferred_element_type=jnp.float32) + b1
    h = jnp.maximum(h, 0.0)

    # fc2 (+ folded BN3) + ReLU
    h = jnp.dot(h.astype(jnp.bfloat16), w2_ref[...],
                preferred_element_type=jnp.float32) + b2
    h = jnp.maximum(h, 0.0)                          # (TB, 128)

    # fc3: N=1 output -> VPU multiply + cross-lane reduce instead of an MXU dot.
    logit = jnp.sum(h * w3, axis=-1, keepdims=True) + b3     # (TB, 1)

    out_ref[...] = (1.0 / (1.0 + jnp.exp(-logit))).astype(out_ref.dtype)


def fold_and_pad_params(p):
    """Fold BN1 into (s1,t1), BN2 into fc1, BN3 into fc2; pad to lane multiples."""
    f32 = jnp.float32

    s1 = p["bn1_g"] * jax.lax.rsqrt(p["bn1_v"] + BN_EPS)   # (1, 1000)
    t1 = p["bn1_b"] - p["bn1_m"] * s1
    s2 = p["bn2_g"] * jax.lax.rsqrt(p["bn2_v"] + BN_EPS)   # (1, 1000)
    t2 = p["bn2_b"] - p["bn2_m"] * s2
    s3 = p["bn3_g"] * jax.lax.rsqrt(p["bn3_v"] + BN_EPS)   # (1, 100)
    t3 = p["bn3_b"] - p["bn3_m"] * s3

    # bn2(x @ W1 + b1) == x @ (W1 * s2) + (b1 * s2 + t2); same for bn3 into fc2.
    w1f = p["w1"] * s2                 # (1000, 1000)
    b1f = p["b1"] * s2 + t2            # (1, 1000)
    w2f = p["w2"] * s3                 # (1000, 100)
    b2f = p["b2"] * s3 + t3            # (1, 100)

    w1_pad = jnp.zeros((P_IN, P_IN), f32).at[:C_IN, :C_HID].set(w1f)
    w2_pad = jnp.zeros((P_IN, P_MID), f32).at[:C_HID, :C_MID].set(w2f)

    vec = jnp.zeros((8, P_IN), f32)
    vec = vec.at[0, :C_IN].set(s1[0])
    vec = vec.at[1, :C_IN].set(t1[0])
    vec = vec.at[2, :C_HID].set(b1f[0])
    vec = vec.at[3, :C_MID].set(b2f[0])
    vec = vec.at[4, :C_MID].set(p["w3"][:, 0])       # fc3 weights as a row
    vec = vec.at[5, 0].set(p["b3"][0, 0])

    return {
        "vec": vec,                                  # f32 (8, 1024)
        "w1": w1_pad.astype(jnp.bfloat16),           # bf16 (1024, 1024)
        "w2": w2_pad.astype(jnp.bfloat16),           # bf16 (1024, 128)
    }


def ahp_hp_res50_forward(x, prep):
    """x: (B, 1000) float32. prep: output of fold_and_pad_params."""
    B, C = x.shape
    B_pad = _round_up(max(B, 8), 8)
    x_pad = jnp.zeros((B_pad, P_IN), jnp.float32).at[:B, :C].set(
        x.astype(jnp.float32))

    # Batch grid: single grid point for small B; parallel batch tiles for big B
    # (shards across TensorCores on v7x and pipelines x-tile DMA under the matmuls).
    tile_b = 128 if (B_pad > 128 and B_pad % 128 == 0) else B_pad
    grid = (B_pad // tile_b,)

    cost = pl.CostEstimate(
        flops=2 * B_pad * (P_IN * P_IN + P_IN * P_MID + P_MID),
        transcendentals=B_pad,
        bytes_accessed=(x_pad.size * 4 + prep["w1"].size * 2
                        + prep["w2"].size * 2 + prep["vec"].size * 4 + B_pad * 4),
    )

    out = pl.pallas_call(
        ahp_kernel,
        out_shape=jax.ShapeDtypeStruct((B_pad, 1), jnp.float32),
        grid=grid,
        in_specs=[
            pl.BlockSpec((tile_b, P_IN), lambda i: (i, 0)),   # x tile
            pl.BlockSpec((8, P_IN), lambda i: (0, 0)),        # packed vectors
            pl.BlockSpec((P_IN, P_IN), lambda i: (0, 0)),     # w1 (resident)
            pl.BlockSpec((P_IN, P_MID), lambda i: (0, 0)),    # w2 (resident)
        ],
        out_specs=pl.BlockSpec((tile_b, 1), lambda i: (i, 0)),
        compiler_params=pltpu.CompilerParams(
            dimension_semantics=("parallel",),
            vmem_limit_bytes=16 << 20,
        ),
        cost_estimate=cost,
    )(x_pad, prep["vec"], prep["w1"], prep["w2"])
    return out[:B]


def init_params(key):
    """Deterministic synthetic parameters matching the PyTorch module shapes."""
    ks = jax.random.split(key, 18)
    f32 = jnp.float32

    def lin(kw, kb, fan_in, fan_out):
        bound = 1.0 / (fan_in ** 0.5)
        w = jax.random.uniform(kw, (fan_in, fan_out), f32, -bound, bound)  # (in, out)
        b = jax.random.uniform(kb, (1, fan_out), f32, -bound, bound)
        return w, b

    def bn(kg, kb, km, kv, c):
        g = 1.0 + 0.1 * jax.random.normal(kg, (1, c), f32)
        b = 0.1 * jax.random.normal(kb, (1, c), f32)
        m = 0.1 * jax.random.normal(km, (1, c), f32)
        v = 1.0 + 0.1 * jax.random.uniform(kv, (1, c), f32)   # strictly positive
        return g, b, m, v

    w1, b1 = lin(ks[0], ks[1], C_IN, C_HID)
    w2, b2 = lin(ks[2], ks[3], C_HID, C_MID)
    w3, b3 = lin(ks[4], ks[5], C_MID, 1)
    bn1_g, bn1_b, bn1_m, bn1_v = bn(ks[6], ks[7], ks[8], ks[9], C_IN)
    bn2_g, bn2_b, bn2_m, bn2_v = bn(ks[10], ks[11], ks[12], ks[13], C_HID)
    bn3_g, bn3_b, bn3_m, bn3_v = bn(ks[14], ks[15], ks[16], ks[17], C_MID)

    return dict(
        w1=w1, b1=b1, w2=w2, b2=b2, w3=w3, b3=b3,
        bn1_g=bn1_g, bn1_b=bn1_b, bn1_m=bn1_m, bn1_v=bn1_v,
        bn2_g=bn2_g, bn2_b=bn2_b, bn2_m=bn2_m, bn2_v=bn2_v,
        bn3_g=bn3_g, bn3_b=bn3_b, bn3_m=bn3_m, bn3_v=bn3_v,
    )


def reference_forward(x, p):
    """Pure-JAX f32 reference replicating the PyTorch module (eval mode)."""
    def bnr(x, g, b, m, v):
        return jnp.maximum((x - m) * jax.lax.rsqrt(v + BN_EPS) * g + b, 0.0)
    x = bnr(x, p["bn1_g"], p["bn1_b"], p["bn1_m"], p["bn1_v"])
    x = x @ p["w1"] + p["b1"]
    x = bnr(x, p["bn2_g"], p["bn2_b"], p["bn2_m"], p["bn2_v"])
    x = x @ p["w2"] + p["b2"]
    x = bnr(x, p["bn3_g"], p["bn3_b"], p["bn3_m"], p["bn3_v"])
    x = x @ p["w3"] + p["b3"]
    return jax.nn.sigmoid(x)


if __name__ == "__main__":
    key = jax.random.PRNGKey(0)
    k_x, k_p = jax.random.split(key)

    B = 8
    x = jax.random.normal(k_x, (B, C_IN), jnp.float32)
    raw_params = init_params(k_p)
    prep = fold_and_pad_params(raw_params)

    out = ahp_hp_res50_forward(x, prep)
    out = jax.block_until_ready(out)

    ref = reference_forward(x, raw_params)
    assert out.shape == (B, 1), out.shape
    max_err = float(jnp.max(jnp.abs(out - ref)))
    # bf16 weights through a 1000-wide contraction -> loosened tolerance.
    assert max_err < 1e-2, f"max abs err {max_err}"
    print("KERNEL_OK")
</pallas_src>

<mosaic_0001>
module attributes {stable_mosaic.version = 11 : i64} {
  func.func @ahp_kernel(%arg0: i32, %arg1: memref<8x1024xf32, #tpu.memory_space<vmem>>, %arg2: memref<8x1024xf32, #tpu.memory_space<vmem>>, %arg3: memref<1024x1024xbf16, #tpu.memory_space<vmem>>, %arg4: memref<1024x128xbf16, #tpu.memory_space<vmem>>, %arg5: memref<8x1xf32, #tpu.memory_space<vmem>>) attributes {dimension_semantics = [#tpu.dimension_semantics<parallel>], iteration_bounds = array<i64: 1>, scalar_prefetch = 0 : i64, scratch_operands = 0 : i64, tpu.core_type = #tpu.core_type<tc>, window_params = [{transform_indices = @transform_0, window_bounds = array<i64: 8, 1024>}, {pipeline_mode = #tpu.pipeline_mode<synchronous>, transform_indices = @transform_1, window_bounds = array<i64: 8, 1024>}, {pipeline_mode = #tpu.pipeline_mode<synchronous>, transform_indices = @transform_2, window_bounds = array<i64: 1024, 1024>}, {pipeline_mode = #tpu.pipeline_mode<synchronous>, transform_indices = @transform_3, window_bounds = array<i64: 1024, 128>}, {transform_indices = @transform_4, window_bounds = array<i64: 8, 1>}]} {
    %c0 = arith.constant 0 : index
    %c0_0 = arith.constant 0 : index
    %0 = vector.load %arg1[%c0, %c0_0] : memref<8x1024xf32, #tpu.memory_space<vmem>>, vector<8x1024xf32>
    %c0_1 = arith.constant 0 : index
    %c0_2 = arith.constant 0 : index
    %1 = vector.load %arg2[%c0_1, %c0_2] : memref<8x1024xf32, #tpu.memory_space<vmem>>, vector<1x1024xf32>
    %c1 = arith.constant 1 : index
    %c0_3 = arith.constant 0 : index
    %2 = vector.load %arg2[%c1, %c0_3] : memref<8x1024xf32, #tpu.memory_space<vmem>>, vector<1x1024xf32>
    %c2 = arith.constant 2 : index
    %c0_4 = arith.constant 0 : index
    %3 = vector.load %arg2[%c2, %c0_4] : memref<8x1024xf32, #tpu.memory_space<vmem>>, vector<1x1024xf32>
    %c3 = arith.constant 3 : index
    %c0_5 = arith.constant 0 : index
    %4 = vector.load %arg2[%c3, %c0_5] : memref<8x1024xf32, #tpu.memory_space<vmem>>, vector<1x128xf32>
    %c4 = arith.constant 4 : index
    %c0_6 = arith.constant 0 : index
    %5 = vector.load %arg2[%c4, %c0_6] : memref<8x1024xf32, #tpu.memory_space<vmem>>, vector<1x128xf32>
    %c5 = arith.constant 5 : index
    %c0_7 = arith.constant 0 : index
    %6 = vector.load %arg2[%c5, %c0_7] : memref<8x1024xf32, #tpu.memory_space<vmem>>, vector<1x1024xf32>
    %7 = vector.extract_strided_slice %6 {offsets = [0, 0], sizes = [1, 1], strides = [1, 1]} : vector<1x1024xf32> to vector<1x1xf32>
    %8 = vector.broadcast %1 : vector<1x1024xf32> to vector<8x1024xf32>
    %9 = arith.mulf %0, %8 : vector<8x1024xf32>
    %10 = vector.broadcast %2 : vector<1x1024xf32> to vector<8x1024xf32>
    %11 = arith.addf %9, %10 : vector<8x1024xf32>
    %cst = arith.constant 0.000000e+00 : f32
    %12 = vector.broadcast %cst : f32 to vector<8x1024xf32>
    %13 = arith.maximumf %11, %12 : vector<8x1024xf32>
    %14 = arith.truncf %13 : vector<8x1024xf32> to vector<8x1024xbf16>
    %c0_8 = arith.constant 0 : index
    %c0_9 = arith.constant 0 : index
    %15 = vector.load %arg3[%c0_8, %c0_9] : memref<1024x1024xbf16, #tpu.memory_space<vmem>>, vector<1024x1024xbf16>
    %cst_10 = arith.constant dense<0.000000e+00> : vector<8x1024xf32>
    %16 = tpu.matmul %14, %15, %cst_10 {dimension_numbers = #tpu.dot_dimension_numbers<[1], [0], [0], [1], [0, 0, 1, 1], [], []>} : vector<8x1024xbf16>, vector<1024x1024xbf16>, vector<8x1024xf32> -> vector<8x1024xf32>
    %17 = vector.broadcast %3 : vector<1x1024xf32> to vector<8x1024xf32>
    %18 = arith.addf %16, %17 : vector<8x1024xf32>
    %cst_11 = arith.constant 0.000000e+00 : f32
    %19 = vector.broadcast %cst_11 : f32 to vector<8x1024xf32>
    %20 = arith.maximumf %18, %19 : vector<8x1024xf32>
    %21 = arith.truncf %20 : vector<8x1024xf32> to vector<8x1024xbf16>
    %c0_12 = arith.constant 0 : index
    %c0_13 = arith.constant 0 : index
    %22 = vector.load %arg4[%c0_12, %c0_13] : memref<1024x128xbf16, #tpu.memory_space<vmem>>, vector<1024x128xbf16>
    %cst_14 = arith.constant dense<0.000000e+00> : vector<8x128xf32>
    %23 = tpu.matmul %21, %22, %cst_14 {dimension_numbers = #tpu.dot_dimension_numbers<[1], [0], [0], [1], [0, 0, 1, 1], [], []>} : vector<8x1024xbf16>, vector<1024x128xbf16>, vector<8x128xf32> -> vector<8x128xf32>
    %24 = vector.broadcast %4 : vector<1x128xf32> to vector<8x128xf32>
    %25 = arith.addf %23, %24 : vector<8x128xf32>
    %cst_15 = arith.constant 0.000000e+00 : f32
    %26 = vector.broadcast %cst_15 : f32 to vector<8x128xf32>
    %27 = arith.maximumf %25, %26 : vector<8x128xf32>
    %28 = vector.broadcast %5 : vector<1x128xf32> to vector<8x128xf32>
    %29 = arith.mulf %27, %28 : vector<8x128xf32>
    %cst_16 = arith.constant dense<0.000000e+00> : vector<8xf32>
    %30 = vector.multi_reduction <add>, %29, %cst_16 [1] : vector<8x128xf32> to vector<8xf32>
    %31 = vector.shape_cast %30 : vector<8xf32> to vector<8x1xf32>
    %32 = vector.broadcast %7 : vector<1x1xf32> to vector<8x1xf32>
    %33 = arith.addf %31, %32 : vector<8x1xf32>
    %cst_17 = arith.constant 0.000000e+00 : f32
    %34 = vector.broadcast %cst_17 : f32 to vector<8x1xf32>
    %35 = arith.subf %34, %33 : vector<8x1xf32>
    %36 = math.exp %35 : vector<8x1xf32>
    %cst_18 = arith.constant 1.000000e+00 : f32
    %37 = vector.broadcast %cst_18 : f32 to vector<8x1xf32>
    %38 = arith.addf %37, %36 : vector<8x1xf32>
    %cst_19 = arith.constant 1.000000e+00 : f32
    %39 = vector.broadcast %cst_19 : f32 to vector<8x1xf32>
    %40 = arith.divf %39, %38 : vector<8x1xf32>
    %c0_20 = arith.constant 0 : index
    %c0_21 = arith.constant 0 : index
    %41 = vector.load %arg5[%c0_20, %c0_21] : memref<8x1xf32, #tpu.memory_space<vmem>>, vector<8x1xf32>
    tpu.vector_store %arg5[%c0_20, %c0_21], %40 {strides = array<i32>} : memref<8x1xf32, #tpu.memory_space<vmem>>, vector<8x1xf32>,
    return
  }
  func.func @transform_0(%arg0: i32) -> (i32, i32) {
    %c0_i32 = arith.constant 0 : i32
    %c0_i32_0 = arith.constant 0 : i32
    return %arg0, %c0_i32 : i32, i32
  }
  func.func @transform_1(%arg0: i32) -> (i32, i32) {
    %c0_i32 = arith.constant 0 : i32
    %c0_i32_0 = arith.constant 0 : i32
    %c0_i32_1 = arith.constant 0 : i32
    return %c0_i32, %c0_i32_0 : i32, i32
  }
  func.func @transform_2(%arg0: i32) -> (i32, i32) {
    %c0_i32 = arith.constant 0 : i32
    %c0_i32_0 = arith.constant 0 : i32
    %c0_i32_1 = arith.constant 0 : i32
    return %c0_i32, %c0_i32_0 : i32, i32
  }
  func.func @transform_3(%arg0: i32) -> (i32, i32) {
    %c0_i32 = arith.constant 0 : i32
    %c0_i32_0 = arith.constant 0 : i32
    %c0_i32_1 = arith.constant 0 : i32
    return %c0_i32, %c0_i32_0 : i32, i32
  }
  func.func @transform_4(%arg0: i32) -> (i32, i32) {
    %c0_i32 = arith.constant 0 : i32
    %c0_i32_0 = arith.constant 0 : i32
    return %arg0, %c0_i32 : i32, i32
  }
}

</mosaic_0001>

<bundles_post_ra>
// kernel: tpu_custom_call.1
= control target key start
LH: loop header
LB: loop body
LE: loop exit
PB: predicated region body
PF: predicated region fallthrough
CT: control target
= control target key end

     0   :  { %9 = vsyncpa [#allocation3], 0  ;;  %s5806_s0 = inlined_call_operand.hbm [shape: f32[8,1024], index: 0, kind: input, shape index: {}]   ;;  %s5807_s1 = inlined_call_operand.hbm [shape: f32[8,1024], index: 1, kind: input, shape index: {}]   ;;  %s5808_s2 = inlined_call_operand.hbm [shape: bf16[1024,1024], index: 2, kind: input, shape index: {}]   ;;  %s5809_s3 = inlined_call_operand.hbm [shape: bf16[1024,128], index: 3, kind: input, shape index: {}]   ;;  %s5810_s4 = inlined_call_operand.vmem [shape: f32[8,1], index: 4, kind: output, shape index: {}]  }
   0x1   :  { %10 = vsyncpa [#allocation5], 0 }
   0x2   :  { %11 = vsyncpa [#allocation8], 0  ;;  %s5581_s15 = smov [#allocation4]   ;;  %s5582_s17 = smov [#allocation2]  }
   0x3   :  { %s28_s16 = sshll.u32 %s5581_s15, 4  ;;  %s18_s18 = sshll.u32 %s5582_s17, 4  ;;  %s29_s16 = int_to_ptr.vmem [resolvable:$true] %s28_s16  ;;  %s19_s18 = int_to_ptr.vmem [resolvable:$true] %s18_s18 }
   0x4   :  { %s5487_s21 = scalar_lea.hbm %s5807_s1, 1024 }
   0x5   :  { %p5488_p0 = scmp.ne.s32.totalorder %s5807_s1, %s5487_s21  ;;  %p5491_p1 = scmp.lt.u32.totalorder %s5487_s21, %s5807_s1 }
   0x7   :  { %p5493_p2 = pnand %p5491_p1, %p5488_p0 }
   0x9   :  { %5496 = shalt.err (!%p5493_p2)
}
   0xa   :  { %s5497_s26 = scalar_lea.vmem %s29_s16, 1024  ;;  %p5502_p4 = scmp.lt.s32.totalorder %s29_s16, %s29_s16 }
   0xb   :  { %p5498_p3 = scmp.ne.s32.totalorder %s29_s16, %s5497_s26  ;;  %p5503_p5 = scmp.lt.s32.totalorder %s5497_s26, %s5497_s26 }
   0xd   :  { %p5504_p6 = por %p5503_p5, %p5502_p4 }
   0xf   :  { %p5505_p7 = pnand %p5504_p6, %p5498_p3 }
  0x11   :  { %5508 = shalt.err (!%p5505_p7)
}
  0x12   :  { %31 = dma.hbm_to_vmem [thread:$0]  %s5807_s1, 1024, %s29_s16, [#allocation5]  }
  0x13   :  { %s5509_s5 = scalar_lea.hbm %s5806_s0, 1024 }
  0x14   :  { %p5510_p8 = scmp.ne.s32.totalorder %s5806_s0, %s5509_s5  ;;  %p5513_p9 = scmp.lt.u32.totalorder %s5509_s5, %s5806_s0 }
  0x16   :  { %p5515_p10 = pnand %p5513_p9, %p5510_p8 }
  0x18   :  { %5518 = shalt.err (!%p5515_p10)
}
  0x19   :  { %s5519_s10 = scalar_lea.vmem %s19_s18, 1024  ;;  %p5524_p12 = scmp.lt.s32.totalorder %s19_s18, %s19_s18 }
  0x1a   :  { %p5520_p11 = scmp.ne.s32.totalorder %s19_s18, %s5519_s10  ;;  %p5525_p13 = scmp.lt.s32.totalorder %s5519_s10, %s5519_s10 }
  0x1c   :  { %p5526_p0 = por %p5525_p13, %p5524_p12 }
  0x1e   :  { %p5527_p1 = pnand %p5526_p0, %p5520_p11 }
  0x20   :  { %5530 = shalt.err (!%p5527_p1)
}
  0x21   :  { %21 = dma.hbm_to_vmem [thread:$0]  %s5806_s0, 1024, %s19_s18, [#allocation3]  }
  0x22   :  { %s5583_s12 = smov [#allocation6]   ;;  %s5531_s16 = scalar_lea.hbm %s5808_s2, 65536 }
  0x23   :  { %s37_s13 = sshll.u32 %s5583_s12, 4  ;;  %p5532_p2 = scmp.ne.s32.totalorder %s5808_s2, %s5531_s16  ;;  %s38_s13 = int_to_ptr.vmem [resolvable:$true] %s37_s13 }
  0x24   :  { %p5535_p3 = scmp.lt.u32.totalorder %s5531_s16, %s5808_s2 }
  0x26   :  { %p5537_p4 = pnand %p5535_p3, %p5532_p2 }
  0x28   :  { %5540 = shalt.err (!%p5537_p4)
}
  0x29   :  { %s5541_s22 = scalar_lea.vmem %s38_s13, 65536  ;;  %p5546_p6 = scmp.lt.s32.totalorder %s38_s13, %s38_s13 }
  0x2a   :  { %p5542_p5 = scmp.ne.s32.totalorder %s38_s13, %s5541_s22  ;;  %p5547_p7 = scmp.lt.s32.totalorder %s5541_s22, %s5541_s22 }
  0x2c   :  { %p5548_p8 = por %p5547_p7, %p5546_p6 }
  0x2e   :  { %p5549_p9 = pnand %p5548_p8, %p5542_p5 }
  0x30   :  { %5552 = shalt.err (!%p5549_p9)
}
  0x31   :  { %s5584_s0 = smov 512   ;;  %s5585_s18 = smov 32  }
  0x32   :  { %43 = dma.hbm_to_vmem [thread:$0]  %s5808_s2, 65536, %s38_s13, [#allocation5], %s5584_s0, %s5584_s0, %s5585_s18  }
  0x33   :  { %s5586_s25 = smov [#allocation7]   ;;  %s5553_s29 = scalar_lea.hbm %s5809_s3, 8192 }
  0x34   :  { %s49_s26 = sshll.u32 %s5586_s25, 4  ;;  %p5554_p10 = scmp.ne.s32.totalorder %s5809_s3, %s5553_s29  ;;  %s50_s26 = int_to_ptr.vmem [resolvable:$true] %s49_s26 }
  0x35   :  { %p5557_p11 = scmp.lt.u32.totalorder %s5553_s29, %s5809_s3 }
  0x37   :  { %p5559_p12 = pnand %p5557_p11, %p5554_p10 }
  0x39   :  { %5562 = shalt.err (!%p5559_p12)
}
  0x3a   :  { %s5563_s8 = scalar_lea.vmem %s50_s26, 8192  ;;  %p5568_p0 = scmp.lt.s32.totalorder %s50_s26, %s50_s26 }
  0x3b   :  { %p5564_p13 = scmp.ne.s32.totalorder %s50_s26, %s5563_s8  ;;  %p5569_p1 = scmp.lt.s32.totalorder %s5563_s8, %s5563_s8 }
  0x3d   :  { %p5570_p2 = por %p5569_p1, %p5568_p0 }
  0x3f   :  { %p5571_p3 = pnand %p5570_p2, %p5564_p13 }
  0x41   :  { %5574 = shalt.err (!%p5571_p3)
}
  0x42   :  { %s5587_s2 = smov 64   ;;  %s5588_s9 = smov 4  }
  0x43   :  { %55 = dma.hbm_to_vmem [thread:$0]  %s5809_s3, 8192, %s50_s26, [#allocation8], %s5587_s2, %s5587_s2, %s5588_s9  }
  0x44   :  { %5575 = dma.done.wait [#allocation3], 1024  }
  0x45   :  { %5576 = vsyncadd [#allocation3], 4294966272 }
  0x46   :  { %5577 = dma.done.wait [#allocation5], 66560  }
  0x47   :  { %5578 = vsyncadd [#allocation5], 4294900736 }
  0x48   :  { %5579 = dma.done.wait [#allocation8], 8192  }
  0x49   :  { %5580 = vsyncadd [#allocation8], 4294959104  ;;  %v208_v0 = vld [vmem:[#allocation6] sm:$0xff]  ;;  %v209_v2 = vld [vmem:[#allocation6 + $0x8] sm:$0xff]  ;;  %v95_v37 = vlaneseq  ;;  %vm4682_vm0 = vcmask 7168  }
  0x4a   :  { %v212_v1 = vld [vmem:[#allocation6 + $0x20] sm:$0xff]  ;;  %v213_v4 = vld [vmem:[#allocation6 + $0x28] sm:$0xff] }
  0x4b   :  { %v4692_v3 = vcombine.high %v208_v0, %v212_v1  ;;  %v4691_v5 = vcombine.low %v208_v0, %v212_v1  ;;  %v216_v6 = vld [vmem:[#allocation6 + $0x40] sm:$0xff]  ;;  %v4694_v8 = vcombine.high %v209_v2, %v213_v4  ;;  %v4693_v9 = vcombine.low %v209_v2, %v213_v4  ;;  %v217_v11 = vld [vmem:[#allocation6 + $0x48] sm:$0xff] }
  0x4c   :  { %v220_v7 = vld [vmem:[#allocation6 + $0x60] sm:$0xff]  ;;  %v221_v12 = vld [vmem:[#allocation6 + $0x68] sm:$0xff]  ;;  %v5662_v46 = vshrl.u32 %v95_v37, 7 }
  0x4d   :  { %v4700_v10 = vcombine.high %v216_v6, %v220_v7  ;;  %v224_v13 = vld [vmem:[#allocation6 + $0x80] sm:$0xff]  ;;  %3321 = vmatprep.subr.bf16.mxu0 %v4692_v3  ;;  %v4702_v14 = vcombine.high %v217_v11, %v221_v12  ;;  %v225_v16 = vld [vmem:[#allocation6 + $0x88] sm:$0xff]  ;;  %3485 = vmatprep.subr.bf16.mxu1 %v4694_v8  ;;  %v4699_v18 = vcombine.low %v216_v6, %v220_v7 }
  0x4e   :  { %v228_v15 = vld [vmem:[#allocation6 + $0xa0] sm:$0xff]  ;;  %v229_v17 = vld [vmem:[#allocation6 + $0xa8] sm:$0xff]  ;;  %3322 = vmatpush1.bf16.msra.mxu0 %v4691_v5  ;;  %3486 = vmatpush1.bf16.msra.mxu1 %v4693_v9  ;;  %v4701_v19 = vcombine.low %v217_v11, %v221_v12  ;;  %v5665_v58 = vsub.s32 1, %v5662_v46 }
  0x4f   :  { %3323 = vmatprep.subr.bf16.mxu0 %v4700_v10  ;;  %v4708_v20 = vcombine.high %v224_v13, %v228_v15  ;;  %3487 = vmatprep.subr.bf16.mxu1 %v4702_v14  ;;  %v4710_v21 = vcombine.high %v225_v16, %v229_v17  ;;  %v232_v22 = vld [vmem:[#allocation6 + $0xc0] sm:$0xff]  ;;  %v233_v24 = vld [vmem:[#allocation6 + $0xc8] sm:$0xff]  ;;  %v4707_v26 = vcombine.low %v224_v13, %v228_v15 }
  0x50   :  { %v236_v23 = vld [vmem:[#allocation6 + $0xe0] sm:$0xff]  ;;  %v237_v25 = vld [vmem:[#allocation6 + $0xe8] sm:$0xff]  ;;  %v4709_v27 = vcombine.low %v225_v16, %v229_v17 }
  0x51   :  { %v4716_v28 = vcombine.high %v232_v22, %v236_v23  ;;  %v4718_v29 = vcombine.high %v233_v24, %v237_v25  ;;  %v240_v30 = vld [vmem:[#allocation6 + $0x100] sm:$0xff]  ;;  %v241_v32 = vld [vmem:[#allocation6 + $0x108] sm:$0xff]  ;;  %v4715_v34 = vcombine.low %v232_v22, %v236_v23  ;;  %v4717_v35 = vcombine.low %v233_v24, %v237_v25 }
  0x52   :  { %3324 = vmatpush1.bf16.msra.mxu0 %v4699_v18  ;;  %3488 = vmatpush1.bf16.msra.mxu1 %v4701_v19  ;;  %v244_v31 = vld [vmem:[#allocation6 + $0x120] sm:$0xff]  ;;  %v245_v33 = vld [vmem:[#allocation6 + $0x128] sm:$0xff] }
  0x53   :  { %3325 = vmatprep.subr.bf16.mxu0 %v4708_v20  ;;  %3489 = vmatprep.subr.bf16.mxu1 %v4710_v21  ;;  %v4724_v36 = vcombine.high %v240_v30, %v244_v31  ;;  %v4726_v38 = vcombine.high %v241_v32, %v245_v33  ;;  %v248_v39 = vld [vmem:[#allocation6 + $0x140] sm:$0xff]  ;;  %v249_v41 = vld [vmem:[#allocation6 + $0x148] sm:$0xff]  ;;  %v4723_v43 = vcombine.low %v240_v30, %v244_v31 }
  0x54   :  { %v252_v40 = vld [vmem:[#allocation6 + $0x160] sm:$0xff]  ;;  %v253_v42 = vld [vmem:[#allocation6 + $0x168] sm:$0xff]  ;;  %v4725_v44 = vcombine.low %v241_v32, %v245_v33 }
  0x55   :  { %v4732_v45 = vcombine.high %v248_v39, %v252_v40  ;;  %v4734_v47 = vcombine.high %v249_v41, %v253_v42  ;;  %v256_v48 = vld [vmem:[#allocation6 + $0x180] sm:$0xff]  ;;  %v257_v50 = vld [vmem:[#allocation6 + $0x188] sm:$0xff]  ;;  %v4731_v52 = vcombine.low %v248_v39, %v252_v40  ;;  %v4733_v53 = vcombine.low %v249_v41, %v253_v42 }
  0x56   :  { %3326 = vmatpush1.bf16.msra.mxu0 %v4707_v26  ;;  %3490 = vmatpush1.bf16.msra.mxu1 %v4709_v27  ;;  %v260_v49 = vld [vmem:[#allocation6 + $0x1a0] sm:$0xff]  ;;  %v261_v51 = vld [vmem:[#allocation6 + $0x1a8] sm:$0xff] }
  0x57   :  { %3327 = vmatprep.subr.bf16.mxu0 %v4716_v28  ;;  %3491 = vmatprep.subr.bf16.mxu1 %v4718_v29  ;;  %v4740_v54 = vcombine.high %v256_v48, %v260_v49  ;;  %v264_v55 = vld [vmem:[#allocation6 + $0x1c0] sm:$0xff]  ;;  %v4742_v59 = vcombine.high %v257_v50, %v261_v51  ;;  %v265_v62 = vld [vmem:[#allocation6 + $0x1c8] sm:$0xff]  ;;  %v4739_v2 = vcombine.low %v256_v48, %v260_v49 }
  0x58   :  { %v268_v56 = vld [vmem:[#allocation6 + $0x1e0] sm:$0xff]  ;;  %v269_v63 = vld [vmem:[#allocation6 + $0x1e8] sm:$0xff]  ;;  %v4741_v5 = vcombine.low %v257_v50, %v261_v51  ;;  %v5680_v51 = vsub.s32 0, %v5662_v46 }
  0x59   :  { %v77_v57 = vld [vmem:[#allocation4] ss:$8 sm:$0xf]  ;;  %v81_v61 = vld [vmem:[#allocation4 + $0x1] ss:$8 sm:$0xf]  ;;  %v4748_v6 = vcombine.high %v264_v55, %v268_v56  ;;  %v4750_v8 = vcombine.high %v265_v62, %v269_v63  ;;  %v4747_v15 = vcombine.low %v264_v55, %v268_v56  ;;  %v4749_v16 = vcombine.low %v265_v62, %v269_v63 }
  0x5a   :  { %3328 = vmatpush1.bf16.msra.mxu0 %v4715_v34  ;;  %3492 = vmatpush1.bf16.msra.mxu1 %v4717_v35  ;;  %v78_v60 = vld [vmem:[#allocation4] ss:$8 sm:$0xf0]  ;;  %v82_v1 = vld [vmem:[#allocation4 + $0x1] ss:$8 sm:$0xf0] }
  0x5b   :  { %3329 = vmatprep.subr.bf16.mxu0 %v4724_v36  ;;  %3493 = vmatprep.subr.bf16.mxu1 %v4726_v38  ;;  %v5667_v0 = vor.u32 %v78_v60, %v77_v57  ;;  %v70_v3 = vld [vmem:[#allocation2 + $0x8] sm:$0xff]  ;;  %v5669_v4 = vor.u32 %v82_v1, %v81_v61  ;;  %v272_v9 = vld [vmem:[#allocation6 + $0x200] sm:$0xff] }
  0x5c   :  { %v276_v10 = vld [vmem:[#allocation6 + $0x220] sm:$0xff]  ;;  %v273_v12 = vld [vmem:[#allocation6 + $0x208] sm:$0xff] }
  0x5d   :  { %v102_v7 = vrot.slane %v5667_v0, %v5665_v58  ;;  %v151_v11 = vrot.slane %v5669_v4, %v5665_v58  ;;  %v277_v13 = vld [vmem:[#allocation6 + $0x228] sm:$0xff]  ;;  %v4756_v17 = vcombine.high %v272_v9, %v276_v10  ;;  %v280_v20 = vld [vmem:[#allocation6 + $0x240] sm:$0xff]  ;;  %v4755_v25 = vcombine.low %v272_v9, %v276_v10 }
  0x5e   :  { %3330 = vmatpush1.bf16.msra.mxu0 %v4723_v43  ;;  %3494 = vmatpush1.bf16.msra.mxu1 %v4725_v44  ;;  %v4758_v19 = vcombine.high %v273_v12, %v277_v13  ;;  %v284_v21 = vld [vmem:[#allocation6 + $0x260] sm:$0xff]  ;;  %v281_v22 = vld [vmem:[#allocation6 + $0x248] sm:$0xff]  ;;  %v4757_v26 = vcombine.low %v273_v12, %v277_v13  ;;  %v98_v62 = vrot.slane %v5667_v0, %v5680_v51  ;;  %v72_v13 = vld [vmem:[#allocation2 + $0x18] sm:$0xff] }
  0x5f   :  { %3331 = vmatprep.subr.bf16.mxu0 %v4732_v45  ;;  %3495 = vmatprep.subr.bf16.mxu1 %v4734_v47  ;;  %v136_v14 = vmul.f32 %v102_v7, %v70_v3  ;;  %v285_v23 = vld [vmem:[#allocation6 + $0x268] sm:$0xff]  ;;  %v4764_v27 = vcombine.high %v280_v20, %v284_v21  ;;  %v288_v30 = vld [vmem:[#allocation6 + $0x280] sm:$0xff]  ;;  %v4763_v34 = vcombine.low %v280_v20, %v284_v21 }
  0x60   :  { %v4766_v29 = vcombine.high %v281_v22, %v285_v23  ;;  %v292_v31 = vld [vmem:[#allocation6 + $0x2a0] sm:$0xff]  ;;  %v289_v32 = vld [vmem:[#allocation6 + $0x288] sm:$0xff]  ;;  %v4765_v35 = vcombine.low %v281_v22, %v285_v23  ;;  %v147_v12 = vrot.slane %v5669_v4, %v5680_v51 }
  0x61   :  { %v185_v18 = vadd.f32 %v151_v11, %v136_v14  ;;  %v293_v33 = vld [vmem:[#allocation6 + $0x2a8] sm:$0xff]  ;;  %v4772_v36 = vcombine.high %v288_v30, %v292_v31  ;;  %v296_v38 = vld [vmem:[#allocation6 + $0x2c0] sm:$0xff]  ;;  %v4771_v42 = vcombine.low %v288_v30, %v292_v31 }
  0x62   :  { %3332 = vmatpush1.bf16.msra.mxu0 %v4731_v52  ;;  %3496 = vmatpush1.bf16.msra.mxu1 %v4733_v53  ;;  %v4774_v37 = vcombine.high %v289_v32, %v293_v33  ;;  %v300_v39 = vld [vmem:[#allocation6 + $0x2e0] sm:$0xff]  ;;  %v297_v40 = vld [vmem:[#allocation6 + $0x2c8] sm:$0xff]  ;;  %v4773_v43 = vcombine.low %v289_v32, %v293_v33 }
  0x63   :  { %3333 = vmatprep.subr.bf16.mxu0 %v4740_v54  ;;  %3497 = vmatprep.subr.bf16.mxu1 %v4742_v59  ;;  %v193_v24 = vmax.f32 %v185_v18, 0.0  ;;  %v301_v41 = vld [vmem:[#allocation6 + $0x2e8] sm:$0xff]  ;;  %v4780_v44 = vcombine.high %v296_v38, %v300_v39  ;;  %v304_v47 = vld [vmem:[#allocation6 + $0x300] sm:$0xff]  ;;  %v4779_v52 = vcombine.low %v296_v38, %v300_v39  ;;  %v5683_v59 = vsub.s32 3, %v5662_v46 }
  0x64   :  { %v4782_v45 = vcombine.high %v297_v40, %v301_v41  ;;  %v308_v48 = vld [vmem:[#allocation6 + $0x320] sm:$0xff]  ;;  %v305_v49 = vld [vmem:[#allocation6 + $0x308] sm:$0xff]  ;;  %v4781_v53 = vcombine.low %v297_v40, %v301_v41 }
  0x65   :  { %v5675_v28 = vpack.c.bf16 %v193_v24, %v193_v24  ;;  %v309_v50 = vld [vmem:[#allocation6 + $0x328] sm:$0xff]  ;;  %v4788_v54 = vcombine.high %v304_v47, %v308_v48  ;;  %v312_v56 = vld [vmem:[#allocation6 + $0x340] sm:$0xff]  ;;  %v4787_v63 = vcombine.low %v304_v47, %v308_v48  ;;  %v159_v21 = vrot.slane %v5669_v4, %v5683_v59 }
  0x66   :  { %3334 = vmatpush1.bf16.msra.mxu0 %v4739_v2  ;;  %3498 = vmatpush1.bf16.msra.mxu1 %v4741_v5  ;;  %v4790_v55 = vcombine.high %v305_v49, %v309_v50  ;;  %v316_v57 = vld [vmem:[#allocation6 + $0x360] sm:$0xff]  ;;  %v313_v60 = vld [vmem:[#allocation6 + $0x348] sm:$0xff]  ;;  %v4789_v2 = vcombine.low %v305_v49, %v309_v50 }
  0x67   :  { %3335 = vmatprep.subr.bf16.mxu0 %v4748_v6  ;;  %3499 = vmatprep.subr.bf16.mxu1 %v4750_v8  ;;  %v317_v61 = vld [vmem:[#allocation6 + $0x368] sm:$0xff]  ;;  %v69_v1 = vld [vmem:[#allocation2] sm:$0xff]  ;;  %v4796_v3 = vcombine.high %v312_v56, %v316_v57  ;;  %v110_v8 = vrot.slane %v5667_v0, %v5683_v59  ;;  %v4795_v14 = vcombine.low %v312_v56, %v316_v57 }
  0x68   :  { %3353 = vmatprep.mubr.bf16.mxu0 %v5675_v28  ;;  %3517 = vmatprep.mubr.bf16.mxu1 %v5675_v28  ;;  %v4798_v5 = vcombine.high %v313_v60, %v317_v61  ;;  %v320_v6 = vld [vmem:[#allocation6 + $0x380] sm:$0xff]  ;;  %v321_v9 = vld [vmem:[#allocation6 + $0x388] sm:$0xff]  ;;  %v135_v11 = vmul.f32 %v98_v62, %v69_v1 }
  0x69   :  { %v324_v7 = vld [vmem:[#allocation6 + $0x3a0] sm:$0xff]  ;;  %v325_v10 = vld [vmem:[#allocation6 + $0x3a8] sm:$0xff]  ;;  %v138_v20 = vmul.f32 %v110_v8, %v72_v13 }
  0x6a   :  { %3336 = vmatpush1.bf16.msra.mxu0 %v4747_v15  ;;  %3500 = vmatpush1.bf16.msra.mxu1 %v4749_v16  ;;  %v4797_v15 = vcombine.low %v313_v60, %v317_v61  ;;  %v4804_v16 = vcombine.high %v320_v6, %v324_v7  ;;  %v328_v18 = vld [vmem:[#allocation6 + $0x3c0] sm:$0xff]  ;;  %v329_v22 = vld [vmem:[#allocation6 + $0x3c8] sm:$0xff]  ;;  %v184_v24 = vadd.f32 %v147_v12, %v135_v11 }
  0x6b   :  { %3337 = vmatprep.subr.bf16.mxu0 %v4756_v17  ;;  %3501 = vmatprep.subr.bf16.mxu1 %v4758_v19  ;;  %v4806_v17 = vcombine.high %v321_v9, %v325_v10  ;;  %v332_v19 = vld [vmem:[#allocation6 + $0x3e0] sm:$0xff]  ;;  %v333_v23 = vld [vmem:[#allocation6 + $0x3e8] sm:$0xff]  ;;  %v187_v32 = vadd.f32 %v159_v21, %v138_v20 }
  0x6c   :  { %v336_v30 = vld [vmem:[#allocation6 + $0x400] sm:$0xff]  ;;  %v337_v33 = vld [vmem:[#allocation6 + $0x408] sm:$0xff] }
  0x6d   :  { %v340_v31 = vld [vmem:[#allocation6 + $0x420] sm:$0xff]  ;;  %v357_v56 = vld [vmem:[#allocation6 + $0x4a8] sm:$0xff] }
  0x6e   :  { %3338 = vmatpush1.bf16.msra.mxu0 %v4755_v25  ;;  %3502 = vmatpush1.bf16.msra.mxu1 %v4757_v26  ;;  %v4803_v25 = vcombine.low %v320_v6, %v324_v7  ;;  %v4805_v26 = vcombine.low %v321_v9, %v325_v10  ;;  %v4820_v38 = vcombine.high %v336_v30, %v340_v31  ;;  %v344_v40 = vld [vmem:[#allocation6 + $0x440] sm:$0xff]  ;;  %v361_v1 = vld [vmem:[#allocation6 + $0x4c8] sm:$0xff] }
  0x6f   :  { %3339 = vmatprep.subr.bf16.mxu0 %v4764_v27  ;;  %3503 = vmatprep.subr.bf16.mxu1 %v4766_v29  ;;  %v4812_v27 = vcombine.high %v328_v18, %v332_v19  ;;  %v4814_v29 = vcombine.high %v329_v22, %v333_v23  ;;  %v348_v41 = vld [vmem:[#allocation6 + $0x460] sm:$0xff]  ;;  %v4819_v47 = vcombine.low %v336_v30, %v340_v31  ;;  %v369_v10 = vld [vmem:[#allocation6 + $0x508] sm:$0xff] }
  0x70   :  { %v4828_v49 = vcombine.high %v344_v40, %v348_v41  ;;  %v4827_v57 = vcombine.low %v344_v40, %v348_v41  ;;  %v360_v62 = vld [vmem:[#allocation6 + $0x4c0] sm:$0xff]  ;;  %v373_v12 = vld [vmem:[#allocation6 + $0x528] sm:$0xff] }
  0x71   :  { %v368_v8 = vld [vmem:[#allocation6 + $0x500] sm:$0xff]  ;;  %v381_v20 = vld [vmem:[#allocation6 + $0x568] sm:$0xff] }
  0x72   :  { %3340 = vmatpush1.bf16.msra.mxu0 %v4763_v34  ;;  %3504 = vmatpush1.bf16.msra.mxu1 %v4765_v35  ;;  %v341_v34 = vld [vmem:[#allocation6 + $0x428] sm:$0xff]  ;;  %v192_v35 = vmax.f32 %v184_v24, 0.0  ;;  %v372_v9 = vld [vmem:[#allocation6 + $0x520] sm:$0xff] }
  0x73   :  { %3341 = vmatprep.subr.bf16.mxu0 %v4772_v36  ;;  %3505 = vmatprep.subr.bf16.mxu1 %v4774_v37  ;;  %v4811_v36 = vcombine.low %v328_v18, %v332_v19  ;;  %v4813_v37 = vcombine.low %v329_v22, %v333_v23  ;;  %v4822_v39 = vcombine.high %v337_v33, %v341_v34  ;;  %v377_v18 = vld [vmem:[#allocation6 + $0x548] sm:$0xff]  ;;  %v384_v24 = vld [vmem:[#allocation6 + $0x580] sm:$0xff] }
  0x74   :  { %v4821_v48 = vcombine.low %v337_v33, %v341_v34  ;;  %v4854_v19 = vcombine.high %v369_v10, %v373_v12  ;;  %v4851_v21 = vcombine.low %v368_v8, %v372_v9  ;;  %v4853_v22 = vcombine.low %v369_v10, %v373_v12  ;;  %v392_v33 = vld [vmem:[#allocation6 + $0x5c0] sm:$0xff] }
  0x75   :  { %v4861_v31 = vcombine.low %v377_v18, %v381_v20  ;;  %v396_v34 = vld [vmem:[#allocation6 + $0x5e0] sm:$0xff] }
  0x76   :  { %3342 = vmatpush1.bf16.msra.mxu0 %v4771_v42  ;;  %3506 = vmatpush1.bf16.msra.mxu1 %v4773_v43  ;;  %v195_v42 = vmax.f32 %v187_v32, 0.0  ;;  %v5693_v43 = vpack.c.bf16 %v192_v35, %v192_v35  ;;  %v393_v35 = vld [vmem:[#allocation6 + $0x5c8] sm:$0xff]  ;;  %v4876_v40 = vcombine.high %v392_v33, %v396_v34  ;;  %v400_v41 = vld [vmem:[#allocation6 + $0x600] sm:$0xff] }
  0x77   :  { %3343 = vmatprep.subr.bf16.mxu0 %v4780_v44  ;;  %3507 = vmatprep.subr.bf16.mxu1 %v4782_v45  ;;  %v345_v44 = vld [vmem:[#allocation6 + $0x448] sm:$0xff]  ;;  %v428_v10 = vld [vmem:[#allocation6 + $0x6e0] sm:$0xff] }
  0x78   :  { %v349_v45 = vld [vmem:[#allocation6 + $0x468] sm:$0xff] }
  0x79   :  { %v4830_v50 = vcombine.high %v345_v44, %v349_v45  ;;  %v4829_v60 = vcombine.low %v345_v44, %v349_v45  ;;  %v401_v44 = vld [vmem:[#allocation6 + $0x608] sm:$0xff] }
  0x7a   :  { %3344 = vmatpush1.bf16.msra.mxu0 %v4779_v52  ;;  %3508 = vmatpush1.bf16.msra.mxu1 %v4781_v53  ;;  %v352_v52 = vld [vmem:[#allocation6 + $0x480] sm:$0xff] }
  0x7b   :  { %3345 = vmatprep.subr.bf16.mxu0 %v4788_v54  ;;  %3509 = vmatprep.subr.bf16.mxu1 %v4790_v55  ;;  %v356_v53 = vld [vmem:[#allocation6 + $0x4a0] sm:$0xff]  ;;  %v5695_v54 = vpack.c.bf16 %v195_v42, %v195_v42  ;;  %v353_v55 = vld [vmem:[#allocation6 + $0x488] sm:$0xff] }
  0x7c   :  { %v4836_v61 = vcombine.high %v352_v52, %v356_v53  ;;  %v4837_v6 = vcombine.low %v353_v55, %v357_v56  ;;  %v404_v42 = vld [vmem:[#allocation6 + $0x620] sm:$0xff] }
  0x7e   :  { %3346 = vmatpush1.bf16.msra.mxu0 %v4787_v63  ;;  %3510 = vmatpush1.bf16.msra.mxu1 %v4789_v2  ;;  %v364_v63 = vld [vmem:[#allocation6 + $0x4e0] sm:$0xff]  ;;  %v4838_v2 = vcombine.high %v353_v55, %v357_v56  ;;  %v409_v55 = vld [vmem:[#allocation6 + $0x648] sm:$0xff] }
  0x7f   :  { %3347 = vmatprep.subr.bf16.mxu0 %v4796_v3  ;;  %3511 = vmatprep.subr.bf16.mxu1 %v4798_v5  ;;  %v365_v3 = vld [vmem:[#allocation6 + $0x4e8] sm:$0xff]  ;;  %v4835_v5 = vcombine.low %v352_v52, %v356_v53  ;;  %v4844_v7 = vcombine.high %v360_v62, %v364_v63  ;;  %v4843_v13 = vcombine.low %v360_v62, %v364_v63  ;;  %v408_v52 = vld [vmem:[#allocation6 + $0x640] sm:$0xff] }
  0x80   :  { %v4846_v11 = vcombine.high %v361_v1, %v365_v3  ;;  %v412_v53 = vld [vmem:[#allocation6 + $0x660] sm:$0xff] }
  0x81   :  { %v4892_v62 = vcombine.high %v408_v52, %v412_v53  ;;  %v416_v63 = vld [vmem:[#allocation6 + $0x680] sm:$0xff] }
  0x82   :  { %3348 = vmatpush1.bf16.msra.mxu0 %v4795_v14  ;;  %3512 = vmatpush1.bf16.msra.mxu1 %v4797_v15  ;;  %v4845_v14 = vcombine.low %v361_v1, %v365_v3  ;;  %v4852_v15 = vcombine.high %v368_v8, %v372_v9  ;;  %v420_v1 = vld [vmem:[#allocation6 + $0x6a0] sm:$0xff] }
  0x83   :  { %3349 = vmatprep.subr.bf16.mxu0 %v4804_v16  ;;  %3513 = vmatprep.subr.bf16.mxu1 %v4806_v17  ;;  %v376_v16 = vld [vmem:[#allocation6 + $0x540] sm:$0xff]  ;;  %v4900_v8 = vcombine.high %v416_v63, %v420_v1 }
  0x84   :  { %v380_v17 = vld [vmem:[#allocation6 + $0x560] sm:$0xff] }
  0x85   :  { %v4860_v23 = vcombine.high %v376_v16, %v380_v17  ;;  %v4859_v30 = vcombine.low %v376_v16, %v380_v17  ;;  %v424_v9 = vld [vmem:[#allocation6 + $0x6c0] sm:$0xff] }
  0x86   :  { %3350 = vmatpush1.bf16.msra.mxu0 %v4803_v25  ;;  %3514 = vmatpush1.bf16.msra.mxu1 %v4805_v26  ;;  %v388_v25 = vld [vmem:[#allocation6 + $0x5a0] sm:$0xff]  ;;  %v385_v26 = vld [vmem:[#allocation6 + $0x588] sm:$0xff]  ;;  %v4908_v16 = vcombine.high %v424_v9, %v428_v10 }
  0x87   :  { %3351 = vmatprep.subr.bf16.mxu0 %v4812_v27  ;;  %3515 = vmatprep.subr.bf16.mxu1 %v4814_v29  ;;  %v4862_v27 = vcombine.high %v377_v18, %v381_v20  ;;  %v389_v29 = vld [vmem:[#allocation6 + $0x5a8] sm:$0xff]  ;;  %v4868_v32 = vcombine.high %v384_v24, %v388_v25  ;;  %v432_v17 = vld [vmem:[#allocation6 + $0x700] sm:$0xff] }
  0x88   :  { %v436_v18 = vld [vmem:[#allocation6 + $0x720] sm:$0xff] }
  0x8a   :  { %3352 = vmatpush1.bf16.msra.mxu0 %v4811_v36  ;;  %3516 = vmatpush1.bf16.msra.mxu1 %v4813_v37  ;;  %v4870_v36 = vcombine.high %v385_v26, %v389_v29  ;;  %v397_v37 = vld [vmem:[#allocation6 + $0x5e8] sm:$0xff] }
  0x8b   :  { %3362 = vmatprep.subr.bf16.mxu0 %v4820_v38  ;;  %3526 = vmatprep.subr.bf16.mxu1 %v4822_v39  ;;  %v4867_v38 = vcombine.low %v384_v24, %v388_v25  ;;  %v4869_v39 = vcombine.low %v385_v26, %v389_v29  ;;  %v4878_v45 = vcombine.high %v393_v35, %v397_v37  ;;  %v440_v24 = vld [vmem:[#allocation6 + $0x740] sm:$0xff]  ;;  %v441_v29 = vld [vmem:[#allocation6 + $0x748] sm:$0xff] }
  0x8c   :  { %v4916_v26 = vcombine.high %v432_v17, %v436_v18 }
  0x8d   :  { %3354 = vmatmul.mubr.bf16.vlgmr.msra.gmra.mrb[0].mxu0 %v5693_v43  ;;  %3518 = vmatmul.mubr.bf16.vlgmr.msra.gmra.mrb[0].mxu1 %v5693_v43 }
  0x8e   :  { %3363 = vmatpush1.bf16.msra.mxu0 %v4819_v47  ;;  %3527 = vmatpush1.bf16.msra.mxu1 %v4821_v48  ;;  %v405_v47 = vld [vmem:[#allocation6 + $0x628] sm:$0xff]  ;;  %v4875_v48 = vcombine.low %v392_v33, %v396_v34  ;;  %v5705_v33 = vsub.s32 5, %v5662_v46 }
  0x8f   :  { %3364 = vmatprep.subr.bf16.mxu0 %v4828_v49  ;;  %3528 = vmatprep.subr.bf16.mxu1 %v4830_v50  ;;  %v4877_v49 = vcombine.low %v393_v35, %v397_v37  ;;  %v4884_v50 = vcombine.high %v400_v41, %v404_v42  ;;  %v4886_v56 = vcombine.high %v401_v44, %v405_v47 }
  0x90   :  { %3394 = vmatprep.mubr.bf16.mxu0 %v5695_v54  ;;  %3558 = vmatprep.mubr.bf16.mxu1 %v5695_v54  ;;  %v4915_v35 = vcombine.low %v432_v17, %v436_v18  ;;  %v473_v18 = vld [vmem:[#allocation6 + $0x848] sm:$0xff] }
  0x92   :  { %3365 = vmatpush1.bf16.msra.mxu0 %v4827_v57  ;;  %3529 = vmatpush1.bf16.msra.mxu1 %v4829_v60  ;;  %v413_v57 = vld [vmem:[#allocation6 + $0x668] sm:$0xff]  ;;  %v4883_v60 = vcombine.low %v400_v41, %v404_v42 }
  0x93   :  { %3366 = vmatprep.subr.bf16.mxu0 %v4836_v61  ;;  %3530 = vmatprep.subr.bf16.mxu1 %v4838_v2  ;;  %v4885_v61 = vcombine.low %v401_v44, %v405_v47  ;;  %v417_v2 = vld [vmem:[#allocation6 + $0x688] sm:$0xff]  ;;  %v4894_v3 = vcombine.high %v409_v55, %v413_v57 }
  0x94   :  { %v453_v41 = vld [vmem:[#allocation6 + $0x7a8] sm:$0xff] }
  0x95   :  { %v74_v44 = vld [vmem:[#allocation2 + $0x28] sm:$0xff] }
  0x96   :  { %3367 = vmatpush1.bf16.msra.mxu0 %v4835_v5  ;;  %3531 = vmatpush1.bf16.msra.mxu1 %v4837_v6  ;;  %v421_v5 = vld [vmem:[#allocation6 + $0x6a8] sm:$0xff]  ;;  %v4891_v6 = vcombine.low %v408_v52, %v412_v53  ;;  %v456_v53 = vld [vmem:[#allocation6 + $0x7c0] sm:$0xff] }
  0x97   :  { %3368 = vmatprep.subr.bf16.mxu0 %v4844_v7  ;;  %3532 = vmatprep.subr.bf16.mxu1 %v4846_v11  ;;  %v4893_v7 = vcombine.low %v409_v55, %v413_v57  ;;  %v425_v11 = vld [vmem:[#allocation6 + $0x6c8] sm:$0xff]  ;;  %v4902_v12 = vcombine.high %v417_v2, %v421_v5  ;;  %v460_v55 = vld [vmem:[#allocation6 + $0x7e0] sm:$0xff] }
  0x98   :  { %v457_v57 = vld [vmem:[#allocation6 + $0x7c8] sm:$0xff] }
  0x9a   :  { %3369 = vmatpush1.bf16.msra.mxu0 %v4843_v13  ;;  %3533 = vmatpush1.bf16.msra.mxu1 %v4845_v14  ;;  %v429_v13 = vld [vmem:[#allocation6 + $0x6e8] sm:$0xff]  ;;  %v4899_v14 = vcombine.low %v416_v63, %v420_v1 }
  0x9b   :  { %3370 = vmatprep.subr.bf16.mxu0 %v4852_v15  ;;  %3534 = vmatprep.subr.bf16.mxu1 %v4854_v19  ;;  %v4901_v15 = vcombine.low %v417_v2, %v421_v5  ;;  %v433_v19 = vld [vmem:[#allocation6 + $0x708] sm:$0xff]  ;;  %v4910_v20 = vcombine.high %v425_v11, %v429_v13  ;;  %v4909_v25 = vcombine.low %v425_v11, %v429_v13  ;;  %v464_v5 = vld [vmem:[#allocation6 + $0x800] sm:$0xff] }
  0x9e   :  { %3371 = vmatpush1.bf16.msra.mxu0 %v4851_v21  ;;  %3535 = vmatpush1.bf16.msra.mxu1 %v4853_v22  ;;  %v437_v21 = vld [vmem:[#allocation6 + $0x728] sm:$0xff]  ;;  %v5702_v22 = vsub.s32 2, %v5662_v46 }
  0x9f   :  { %3372 = vmatprep.subr.bf16.mxu0 %v4860_v23  ;;  %3536 = vmatprep.subr.bf16.mxu1 %v4862_v27  ;;  %v4907_v23 = vcombine.low %v424_v9, %v428_v10  ;;  %v444_v27 = vld [vmem:[#allocation6 + $0x760] sm:$0xff]  ;;  %v4917_v37 = vcombine.low %v433_v19, %v437_v21  ;;  %v469_v10 = vld [vmem:[#allocation6 + $0x828] sm:$0xff] }
  0xa0   :  { %v106_v34 = vrot.slane %v5667_v0, %v5702_v22 }
  0xa2   :  { %3373 = vmatpush1.bf16.msra.mxu0 %v4859_v30  ;;  %3537 = vmatpush1.bf16.msra.mxu1 %v4861_v31  ;;  %v445_v30 = vld [vmem:[#allocation6 + $0x768] sm:$0xff]  ;;  %v4918_v31 = vcombine.high %v433_v19, %v437_v21 }
  0xa3   :  { %3374 = vmatprep.subr.bf16.mxu0 %v4868_v32  ;;  %3538 = vmatprep.subr.bf16.mxu1 %v4870_v36  ;;  %v71_v32 = vld [vmem:[#allocation2 + $0x10] sm:$0xff]  ;;  %v448_v36 = vld [vmem:[#allocation6 + $0x780] sm:$0xff]  ;;  %v4926_v42 = vcombine.high %v441_v29, %v445_v30  ;;  %v477_v21 = vld [vmem:[#allocation6 + $0x868] sm:$0xff] }
  0xa4   :  { %v137_v47 = vmul.f32 %v106_v34, %v71_v32 }
  0xa6   :  { %3375 = vmatpush1.bf16.msra.mxu0 %v4867_v38  ;;  %3539 = vmatpush1.bf16.msra.mxu1 %v4869_v39  ;;  %v4924_v38 = vcombine.high %v440_v24, %v444_v27  ;;  %v452_v39 = vld [vmem:[#allocation6 + $0x7a0] sm:$0xff] }
  0xa7   :  { %3376 = vmatprep.subr.bf16.mxu0 %v4876_v40  ;;  %3540 = vmatprep.subr.bf16.mxu1 %v4878_v45  ;;  %v449_v40 = vld [vmem:[#allocation6 + $0x788] sm:$0xff]  ;;  %v118_v45 = vrot.slane %v5667_v0, %v5705_v33  ;;  %v4932_v52 = vcombine.high %v448_v36, %v452_v39  ;;  %v4931_v1 = vcombine.low %v448_v36, %v452_v39 }
  0xa8   :  { %v4933_v2 = vcombine.low %v449_v40, %v453_v41  ;;  %v489_v39 = vld [vmem:[#allocation6 + $0x8c8] sm:$0xff] }
  0xaa   :  { %3377 = vmatpush1.bf16.msra.mxu0 %v4875_v48  ;;  %3541 = vmatpush1.bf16.msra.mxu1 %v4877_v49  ;;  %v155_v48 = vrot.slane %v5669_v4, %v5702_v22  ;;  %v4923_v49 = vcombine.low %v440_v24, %v444_v27  ;;  %v484_v27 = vld [vmem:[#allocation6 + $0x8a0] sm:$0xff] }
  0xab   :  { %3378 = vmatprep.subr.bf16.mxu0 %v4884_v50  ;;  %3542 = vmatprep.subr.bf16.mxu1 %v4886_v56  ;;  %v4925_v50 = vcombine.low %v441_v29, %v445_v30  ;;  %v4934_v56 = vcombine.high %v449_v40, %v453_v41  ;;  %v481_v29 = vld [vmem:[#allocation6 + $0x888] sm:$0xff]  ;;  %v4958_v30 = vcombine.high %v473_v18, %v477_v21 }
  0xac   :  { %v186_v63 = vadd.f32 %v155_v48, %v137_v47  ;;  %v493_v41 = vld [vmem:[#allocation6 + $0x8e8] sm:$0xff]  ;;  %v496_v48 = vld [vmem:[#allocation6 + $0x900] sm:$0xff] }
  0xad   :  { %v4974_v47 = vcombine.high %v489_v39, %v493_v41 }
  0xae   :  { %3379 = vmatpush1.bf16.msra.mxu0 %v4883_v60  ;;  %3543 = vmatpush1.bf16.msra.mxu1 %v4885_v61  ;;  %v140_v60 = vmul.f32 %v118_v45, %v74_v44  ;;  %v167_v61 = vrot.slane %v5669_v4, %v5705_v33  ;;  %v194_v11 = vmax.f32 %v186_v63, 0.0  ;;  %v509_v63 = vld [vmem:[#allocation6 + $0x968] sm:$0xff] }
  0xaf   :  { %3380 = vmatprep.subr.bf16.mxu0 %v4892_v62  ;;  %3544 = vmatprep.subr.bf16.mxu1 %v4894_v3  ;;  %v461_v62 = vld [vmem:[#allocation6 + $0x7e8] sm:$0xff]  ;;  %v4940_v3 = vcombine.high %v456_v53, %v460_v55 }
  0xb0   :  { %v189_v9 = vadd.f32 %v167_v61, %v140_v60  ;;  %v4941_v13 = vcombine.low %v457_v57, %v461_v62  ;;  %v504_v60 = vld [vmem:[#allocation6 + $0x940] sm:$0xff] }
  0xb1   :  { %v508_v61 = vld [vmem:[#allocation6 + $0x960] sm:$0xff] }
  0xb2   :  { %3381 = vmatpush1.bf16.msra.mxu0 %v4891_v6  ;;  %3545 = vmatpush1.bf16.msra.mxu1 %v4893_v7  ;;  %v4942_v6 = vcombine.high %v457_v57, %v461_v62  ;;  %v468_v7 = vld [vmem:[#allocation6 + $0x820] sm:$0xff]  ;;  %v197_v19 = vmax.f32 %v189_v9, 0.0  ;;  %v505_v62 = vld [vmem:[#allocation6 + $0x948] sm:$0xff] }
  0xb3   :  { %3382 = vmatprep.subr.bf16.mxu0 %v4900_v8  ;;  %3546 = vmatprep.subr.bf16.mxu1 %v4902_v12  ;;  %v465_v8 = vld [vmem:[#allocation6 + $0x808] sm:$0xff]  ;;  %v4939_v12 = vcombine.low %v456_v53, %v460_v55  ;;  %v4973_v55 = vcombine.low %v489_v39, %v493_v41 }
  0xb4   :  { %v4950_v17 = vcombine.high %v465_v8, %v469_v10  ;;  %v4949_v24 = vcombine.low %v465_v8, %v469_v10  ;;  %v5717_v32 = vpack.c.bf16 %v197_v19, %v197_v19  ;;  %v513_v8 = vld [vmem:[#allocation6 + $0x988] sm:$0xff]  ;;  %v4987_v10 = vcombine.low %v504_v60, %v508_v61 }
  0xb5   :  { %v517_v9 = vld [vmem:[#allocation6 + $0x9a8] sm:$0xff] }
  0xb6   :  { %3383 = vmatpush1.bf16.msra.mxu0 %v4899_v14  ;;  %3547 = vmatpush1.bf16.msra.mxu1 %v4901_v15  ;;  %v4948_v14 = vcombine.high %v464_v5, %v468_v7  ;;  %v472_v15 = vld [vmem:[#allocation6 + $0x840] sm:$0xff]  ;;  %v4997_v19 = vcombine.low %v513_v8, %v517_v9 }
  0xb7   :  { %3384 = vmatprep.subr.bf16.mxu0 %v4908_v16  ;;  %3548 = vmatprep.subr.bf16.mxu1 %v4910_v20  ;;  %v476_v16 = vld [vmem:[#allocation6 + $0x860] sm:$0xff]  ;;  %v5715_v20 = vpack.c.bf16 %v194_v11, %v194_v11  ;;  %v4989_v11 = vcombine.low %v505_v62, %v509_v63 }
  0xb8   :  { %v4955_v34 = vcombine.low %v472_v15, %v476_v16 }
  0xba   :  { %3385 = vmatpush1.bf16.msra.mxu0 %v4907_v23  ;;  %3549 = vmatpush1.bf16.msra.mxu1 %v4909_v25  ;;  %v4947_v23 = vcombine.low %v464_v5, %v468_v7  ;;  %v4956_v25 = vcombine.high %v472_v15, %v476_v16  ;;  %v4990_v5 = vcombine.high %v505_v62, %v509_v63  ;;  %v516_v7 = vld [vmem:[#allocation6 + $0x9a0] sm:$0xff]  ;;  %v521_v16 = vld [vmem:[#allocation6 + $0x9c8] sm:$0xff] }
  0xbb   :  { %3386 = vmatprep.subr.bf16.mxu0 %v4916_v26  ;;  %3550 = vmatprep.subr.bf16.mxu1 %v4918_v31  ;;  %v480_v26 = vld [vmem:[#allocation6 + $0x880] sm:$0xff]  ;;  %v485_v31 = vld [vmem:[#allocation6 + $0x8a8] sm:$0xff] }
  0xbc   :  { %v4964_v36 = vcombine.high %v480_v26, %v484_v27  ;;  %v4966_v40 = vcombine.high %v481_v29, %v485_v31  ;;  %v4965_v44 = vcombine.low %v481_v29, %v485_v31  ;;  %v524_v15 = vld [vmem:[#allocation6 + $0x9e0] sm:$0xff] }
  0xbe   :  { %3387 = vmatpush1.bf16.msra.mxu0 %v4915_v35  ;;  %3551 = vmatpush1.bf16.msra.mxu1 %v4917_v37  ;;  %v4957_v35 = vcombine.low %v473_v18, %v477_v21  ;;  %v488_v37 = vld [vmem:[#allocation6 + $0x8c0] sm:$0xff] }
  0xbf   :  { %3388 = vmatprep.subr.bf16.mxu0 %v4924_v38  ;;  %3552 = vmatprep.subr.bf16.mxu1 %v4926_v42  ;;  %v492_v38 = vld [vmem:[#allocation6 + $0x8e0] sm:$0xff]  ;;  %v4963_v42 = vcombine.low %v480_v26, %v484_v27  ;;  %v529_v26 = vld [vmem:[#allocation6 + $0xa08] sm:$0xff] }
  0xc0   :  { %v4972_v45 = vcombine.high %v488_v37, %v492_v38  ;;  %v4971_v53 = vcombine.low %v488_v37, %v492_v38  ;;  %v533_v27 = vld [vmem:[#allocation6 + $0xa28] sm:$0xff] }
  0xc1   :  { %v537_v37 = vld [vmem:[#allocation6 + $0xa48] sm:$0xff] }
  0xc2   :  { %3389 = vmatpush1.bf16.msra.mxu0 %v4923_v49  ;;  %3553 = vmatpush1.bf16.msra.mxu1 %v4925_v50  ;;  %v500_v49 = vld [vmem:[#allocation6 + $0x920] sm:$0xff]  ;;  %v497_v50 = vld [vmem:[#allocation6 + $0x908] sm:$0xff] }
  0xc3   :  { %3390 = vmatprep.subr.bf16.mxu0 %v4932_v52  ;;  %3554 = vmatprep.subr.bf16.mxu1 %v4934_v56  ;;  %v501_v52 = vld [vmem:[#allocation6 + $0x928] sm:$0xff]  ;;  %v4980_v56 = vcombine.high %v496_v48, %v500_v49 }
  0xc4   :  { %v4982_v57 = vcombine.high %v497_v50, %v501_v52  ;;  %v541_v38 = vld [vmem:[#allocation6 + $0xa68] sm:$0xff] }
  0xc6   :  { %3391 = vmatpush1.bf16.msra.mxu0 %v4931_v1  ;;  %3555 = vmatpush1.bf16.msra.mxu1 %v4933_v2  ;;  %v4979_v1 = vcombine.low %v496_v48, %v500_v49  ;;  %v4981_v2 = vcombine.low %v497_v50, %v501_v52  ;;  %v549_v48 = vld [vmem:[#allocation6 + $0xaa8] sm:$0xff]  ;;  %v5021_v50 = vcombine.low %v537_v37, %v541_v38 }
  0xc7   :  { %3392 = vmatprep.subr.bf16.mxu0 %v4940_v3  ;;  %3556 = vmatprep.subr.bf16.mxu1 %v4942_v6  ;;  %v4988_v3 = vcombine.high %v504_v60, %v508_v61  ;;  %v512_v6 = vld [vmem:[#allocation6 + $0x980] sm:$0xff]  ;;  %v557_v60 = vld [vmem:[#allocation6 + $0xae8] sm:$0xff] }
  0xc8   :  { %v4995_v18 = vcombine.low %v512_v6, %v516_v7 }
  0xca   :  { %3393 = vmatpush1.bf16.msra.mxu0 %v4939_v12  ;;  %3557 = vmatpush1.bf16.msra.mxu1 %v4941_v13  ;;  %v4996_v12 = vcombine.high %v512_v6, %v516_v7  ;;  %v4998_v13 = vcombine.high %v513_v8, %v517_v9  ;;  %v565_v6 = vld [vmem:[#allocation6 + $0xb28] sm:$0xff]  ;;  %v5724_v7 = vsub.s32 4, %v5662_v46 }
  0xcb   :  { %3403 = vmatprep.subr.bf16.mxu0 %v4948_v14  ;;  %3567 = vmatprep.subr.bf16.mxu1 %v4950_v17  ;;  %v520_v14 = vld [vmem:[#allocation6 + $0x9c0] sm:$0xff]  ;;  %v525_v17 = vld [vmem:[#allocation6 + $0x9e8] sm:$0xff] }
  0xcc   :  { %v5004_v21 = vcombine.high %v520_v14, %v524_v15  ;;  %v5003_v29 = vcombine.low %v520_v14, %v524_v15  ;;  %v5727_v14 = vsub.s32 7, %v5662_v46  ;;  %v569_v15 = vld [vmem:[#allocation6 + $0xb48] sm:$0xff] }
  0xcd   :  { %3395 = vmatmul.mubr.bf16.vlgmr.msra.gmra.mrb[0].mxu0 %v5715_v20  ;;  %3559 = vmatmul.mubr.bf16.vlgmr.msra.gmra.mrb[0].mxu1 %v5715_v20 }
  0xce   :  { %3404 = vmatpush1.bf16.msra.mxu0 %v4947_v23  ;;  %3568 = vmatpush1.bf16.msra.mxu1 %v4949_v24  ;;  %v5006_v23 = vcombine.high %v521_v16, %v525_v17  ;;  %v528_v24 = vld [vmem:[#allocation6 + $0xa00] sm:$0xff] }
  0xcf   :  { %3405 = vmatprep.subr.bf16.mxu0 %v4956_v25  ;;  %3569 = vmatprep.subr.bf16.mxu1 %v4958_v30  ;;  %v532_v25 = vld [vmem:[#allocation6 + $0xa20] sm:$0xff]  ;;  %v5005_v30 = vcombine.low %v521_v16, %v525_v17  ;;  %v573_v16 = vld [vmem:[#allocation6 + $0xb68] sm:$0xff]  ;;  %v114_v17 = vrot.slane %v5667_v0, %v5724_v7 }
  0xd0   :  { %3435 = vmatprep.mubr.bf16.mxu0 %v5717_v32  ;;  %3599 = vmatprep.mubr.bf16.mxu1 %v5717_v32  ;;  %v5012_v31 = vcombine.high %v528_v24, %v532_v25  ;;  %v5011_v39 = vcombine.low %v528_v24, %v532_v25  ;;  %v5054_v24 = vcombine.high %v569_v15, %v573_v16  ;;  %v576_v25 = vld [vmem:[#allocation6 + $0xb80] sm:$0xff] }
  0xd2   :  { %3406 = vmatpush1.bf16.msra.mxu0 %v4955_v34  ;;  %3570 = vmatpush1.bf16.msra.mxu1 %v4957_v35  ;;  %v5014_v34 = vcombine.high %v529_v26, %v533_v27  ;;  %v536_v35 = vld [vmem:[#allocation6 + $0xa40] sm:$0xff] }
  0xd3   :  { %3407 = vmatprep.subr.bf16.mxu0 %v4964_v36  ;;  %3571 = vmatprep.subr.bf16.mxu1 %v4966_v40  ;;  %v540_v36 = vld [vmem:[#allocation6 + $0xa60] sm:$0xff]  ;;  %v5013_v40 = vcombine.low %v529_v26, %v533_v27  ;;  %v126_v27 = vrot.slane %v5667_v0, %v5727_v14 }
  0xd4   :  { %v5020_v41 = vcombine.high %v536_v35, %v540_v36  ;;  %v5019_v49 = vcombine.low %v536_v35, %v540_v36  ;;  %v580_v26 = vld [vmem:[#allocation6 + $0xba0] sm:$0xff]  ;;  %v76_v35 = vld [vmem:[#allocation2 + $0x38] sm:$0xff] }
  0xd6   :  { %3408 = vmatpush1.bf16.msra.mxu0 %v4963_v42  ;;  %3572 = vmatpush1.bf16.msra.mxu1 %v4965_v44  ;;  %v5022_v42 = vcombine.high %v537_v37, %v541_v38  ;;  %v544_v44 = vld [vmem:[#allocation6 + $0xa80] sm:$0xff]  ;;  %v5053_v37 = vcombine.low %v569_v15, %v573_v16  ;;  %v5060_v38 = vcombine.high %v576_v25, %v580_v26 }
  0xd7   :  { %3409 = vmatprep.subr.bf16.mxu0 %v4972_v45  ;;  %3573 = vmatprep.subr.bf16.mxu1 %v4974_v47  ;;  %v548_v45 = vld [vmem:[#allocation6 + $0xaa0] sm:$0xff]  ;;  %v545_v47 = vld [vmem:[#allocation6 + $0xa88] sm:$0xff] }
  0xd8   :  { %v5028_v52 = vcombine.high %v544_v44, %v548_v45  ;;  %v5027_v61 = vcombine.low %v544_v44, %v548_v45  ;;  %v5029_v62 = vcombine.low %v545_v47, %v549_v48  ;;  %v175_v44 = vrot.slane %v5669_v4, %v5727_v14  ;;  %v585_v45 = vld [vmem:[#allocation6 + $0xbc8] sm:$0xff] }
  0xda   :  { %3410 = vmatpush1.bf16.msra.mxu0 %v4971_v53  ;;  %3574 = vmatpush1.bf16.msra.mxu1 %v4973_v55  ;;  %v5030_v53 = vcombine.high %v545_v47, %v549_v48  ;;  %v552_v55 = vld [vmem:[#allocation6 + $0xac0] sm:$0xff]  ;;  %v589_v47 = vld [vmem:[#allocation6 + $0xbe8] sm:$0xff] }
  0xdb   :  { %3411 = vmatprep.subr.bf16.mxu0 %v4980_v56  ;;  %3575 = vmatprep.subr.bf16.mxu1 %v4982_v57  ;;  %v556_v56 = vld [vmem:[#allocation6 + $0xae0] sm:$0xff]  ;;  %v553_v57 = vld [vmem:[#allocation6 + $0xac8] sm:$0xff] }
  0xdc   :  { %v5036_v63 = vcombine.high %v552_v55, %v556_v56  ;;  %v5035_v8 = vcombine.low %v552_v55, %v556_v56  ;;  %v5037_v9 = vcombine.low %v553_v57, %v557_v60  ;;  %v592_v55 = vld [vmem:[#allocation6 + $0xc00] sm:$0xff] }
  0xdd   :  { %v596_v56 = vld [vmem:[#allocation6 + $0xc20] sm:$0xff] }
  0xde   :  { %3412 = vmatpush1.bf16.msra.mxu0 %v4979_v1  ;;  %3576 = vmatpush1.bf16.msra.mxu1 %v4981_v2  ;;  %v5038_v1 = vcombine.high %v553_v57, %v557_v60  ;;  %v560_v2 = vld [vmem:[#allocation6 + $0xb00] sm:$0xff]  ;;  %v593_v60 = vld [vmem:[#allocation6 + $0xc08] sm:$0xff] }
  0xdf   :  { %3413 = vmatprep.subr.bf16.mxu0 %v4988_v3  ;;  %3577 = vmatprep.subr.bf16.mxu1 %v4990_v5  ;;  %v564_v3 = vld [vmem:[#allocation6 + $0xb20] sm:$0xff]  ;;  %v561_v5 = vld [vmem:[#allocation6 + $0xb08] sm:$0xff] }
  0xe2   :  { %3414 = vmatpush1.bf16.msra.mxu0 %v4987_v10  ;;  %3578 = vmatpush1.bf16.msra.mxu1 %v4989_v11  ;;  %v5044_v10 = vcombine.high %v560_v2, %v564_v3  ;;  %v5046_v11 = vcombine.high %v561_v5, %v565_v6 }
  0xe3   :  { %3415 = vmatprep.subr.bf16.mxu0 %v4996_v12  ;;  %3579 = vmatprep.subr.bf16.mxu1 %v4998_v13  ;;  %v568_v12 = vld [vmem:[#allocation6 + $0xb40] sm:$0xff] }
  0xe4   :  { %v572_v13 = vld [vmem:[#allocation6 + $0xb60] sm:$0xff] }
  0xe5   :  { %v5051_v36 = vcombine.low %v568_v12, %v572_v13 }
  0xe6   :  { %3416 = vmatpush1.bf16.msra.mxu0 %v4995_v18  ;;  %3580 = vmatpush1.bf16.msra.mxu1 %v4997_v19  ;;  %v5043_v18 = vcombine.low %v560_v2, %v564_v3  ;;  %v73_v19 = vld [vmem:[#allocation2 + $0x20] sm:$0xff]  ;;  %v5076_v2 = vcombine.high %v592_v55, %v596_v56 }
  0xe7   :  { %3417 = vmatprep.subr.bf16.mxu0 %v5004_v21  ;;  %3581 = vmatprep.subr.bf16.mxu1 %v5006_v23  ;;  %v5045_v21 = vcombine.low %v561_v5, %v565_v6  ;;  %v5052_v23 = vcombine.high %v568_v12, %v572_v13  ;;  %v600_v5 = vld [vmem:[#allocation6 + $0xc40] sm:$0xff]  ;;  %v5075_v12 = vcombine.low %v592_v55, %v596_v56 }
  0xe8   :  { %v604_v6 = vld [vmem:[#allocation6 + $0xc60] sm:$0xff] }
  0xe9   :  { %v5084_v15 = vcombine.high %v600_v5, %v604_v6 }
  0xea   :  { %3418 = vmatpush1.bf16.msra.mxu0 %v5003_v29  ;;  %3582 = vmatpush1.bf16.msra.mxu1 %v5005_v30  ;;  %v577_v29 = vld [vmem:[#allocation6 + $0xb88] sm:$0xff] }
  0xeb   :  { %3419 = vmatprep.subr.bf16.mxu0 %v5012_v31  ;;  %3583 = vmatprep.subr.bf16.mxu1 %v5014_v34  ;;  %v581_v30 = vld [vmem:[#allocation6 + $0xba8] sm:$0xff]  ;;  %v139_v31 = vmul.f32 %v114_v17, %v73_v19  ;;  %v163_v34 = vrot.slane %v5669_v4, %v5724_v7  ;;  %v608_v17 = vld [vmem:[#allocation6 + $0xc80] sm:$0xff] }
  0xed   :  { %v188_v48 = vadd.f32 %v163_v34, %v139_v31  ;;  %v617_v31 = vld [vmem:[#allocation6 + $0xcc8] sm:$0xff] }
  0xee   :  { %3420 = vmatpush1.bf16.msra.mxu0 %v5011_v39  ;;  %3584 = vmatpush1.bf16.msra.mxu1 %v5013_v40  ;;  %v5062_v39 = vcombine.high %v577_v29, %v581_v30  ;;  %v584_v40 = vld [vmem:[#allocation6 + $0xbc0] sm:$0xff]  ;;  %v621_v34 = vld [vmem:[#allocation6 + $0xce8] sm:$0xff] }
  0xef   :  { %3421 = vmatprep.subr.bf16.mxu0 %v5020_v41  ;;  %3585 = vmatprep.subr.bf16.mxu1 %v5022_v42  ;;  %v588_v41 = vld [vmem:[#allocation6 + $0xbe0] sm:$0xff]  ;;  %v142_v42 = vmul.f32 %v126_v27, %v76_v35 }
  0xf1   :  { %v191_v57 = vadd.f32 %v175_v44, %v142_v42  ;;  %v629_v42 = vld [vmem:[#allocation6 + $0xd28] sm:$0xff] }
  0xf2   :  { %3422 = vmatpush1.bf16.msra.mxu0 %v5019_v49  ;;  %3586 = vmatpush1.bf16.msra.mxu1 %v5021_v50  ;;  %v5059_v49 = vcombine.low %v576_v25, %v580_v26  ;;  %v5061_v50 = vcombine.low %v577_v29, %v581_v30  ;;  %v616_v29 = vld [vmem:[#allocation6 + $0xcc0] sm:$0xff] }
  0xf3   :  { %3423 = vmatprep.subr.bf16.mxu0 %v5028_v52  ;;  %3587 = vmatprep.subr.bf16.mxu1 %v5030_v53  ;;  %v5068_v52 = vcombine.high %v584_v40, %v588_v41  ;;  %v5070_v53 = vcombine.high %v585_v45, %v589_v47  ;;  %v620_v30 = vld [vmem:[#allocation6 + $0xce0] sm:$0xff] }
  0xf4   :  { %v5099_v44 = vcombine.low %v616_v29, %v620_v30 }
  0xf6   :  { %3424 = vmatpush1.bf16.msra.mxu0 %v5027_v61  ;;  %3588 = vmatpush1.bf16.msra.mxu1 %v5029_v62  ;;  %v597_v61 = vld [vmem:[#allocation6 + $0xc28] sm:$0xff]  ;;  %v196_v62 = vmax.f32 %v188_v48, 0.0 }
  0xf7   :  { %3425 = vmatprep.subr.bf16.mxu0 %v5036_v63  ;;  %3589 = vmatprep.subr.bf16.mxu1 %v5038_v1  ;;  %v5067_v63 = vcombine.low %v584_v40, %v588_v41  ;;  %v5069_v1 = vcombine.low %v585_v45, %v589_v47  ;;  %v5078_v3 = vcombine.high %v593_v60, %v597_v61  ;;  %v628_v40 = vld [vmem:[#allocation6 + $0xd20] sm:$0xff]  ;;  %v625_v41 = vld [vmem:[#allocation6 + $0xd08] sm:$0xff] }
  0xf8   :  { %v5077_v13 = vcombine.low %v593_v60, %v597_v61  ;;  %v5101_v45 = vcombine.low %v617_v31, %v621_v34  ;;  %v5110_v48 = vcombine.high %v625_v41, %v629_v42  ;;  %v5109_v56 = vcombine.low %v625_v41, %v629_v42  ;;  %v640_v61 = vld [vmem:[#allocation6 + $0xd80] sm:$0xff]  ;;  %v673_v42 = vld [vmem:[#allocation6 + $0xe88] sm:$0xff] }
  0xf9   :  { %v676_v41 = vld [vmem:[#allocation6 + $0xea0] sm:$0xff] }
  0xfa   :  { %3426 = vmatpush1.bf16.msra.mxu0 %v5035_v8  ;;  %3590 = vmatpush1.bf16.msra.mxu1 %v5037_v9  ;;  %v199_v8 = vmax.f32 %v191_v57, 0.0  ;;  %v5737_v9 = vpack.c.bf16 %v196_v62, %v196_v62  ;;  %v644_v62 = vld [vmem:[#allocation6 + $0xda0] sm:$0xff] }
  0xfb   :  { %3427 = vmatprep.subr.bf16.mxu0 %v5044_v10  ;;  %3591 = vmatprep.subr.bf16.mxu1 %v5046_v11  ;;  %v601_v10 = vld [vmem:[#allocation6 + $0xc48] sm:$0xff] }
  0xfc   :  { %v605_v11 = vld [vmem:[#allocation6 + $0xc68] sm:$0xff]  ;;  %v5739_v19 = vpack.c.bf16 %v199_v8, %v199_v8  ;;  %v648_v8 = vld [vmem:[#allocation6 + $0xdc0] sm:$0xff] }
  0xfd   :  { %v5086_v16 = vcombine.high %v601_v10, %v605_v11  ;;  %v5085_v25 = vcombine.low %v601_v10, %v605_v11  ;;  %v652_v10 = vld [vmem:[#allocation6 + $0xde0] sm:$0xff]  ;;  %v649_v11 = vld [vmem:[#allocation6 + $0xdc8] sm:$0xff] }
  0xfe   :  { %3428 = vmatpush1.bf16.msra.mxu0 %v5043_v18  ;;  %3592 = vmatpush1.bf16.msra.mxu1 %v5045_v21  ;;  %v612_v18 = vld [vmem:[#allocation6 + $0xca0] sm:$0xff]  ;;  %v609_v21 = vld [vmem:[#allocation6 + $0xc88] sm:$0xff] }
  0xff   :  { %3429 = vmatprep.subr.bf16.mxu0 %v5052_v23  ;;  %3593 = vmatprep.subr.bf16.mxu1 %v5054_v24  ;;  %v613_v23 = vld [vmem:[#allocation6 + $0xca8] sm:$0xff]  ;;  %v5083_v24 = vcombine.low %v600_v5, %v604_v6  ;;  %v5092_v26 = vcombine.high %v608_v17, %v612_v18  ;;  %v5091_v35 = vcombine.low %v608_v17, %v612_v18  ;;  %v656_v18 = vld [vmem:[#allocation6 + $0xe00] sm:$0xff] }
 0x100   :  { %v5094_v27 = vcombine.high %v609_v21, %v613_v23  ;;  %v5124_v5 = vcombine.high %v640_v61, %v644_v62 }
 0x102   :  { %3430 = vmatpush1.bf16.msra.mxu0 %v5051_v36  ;;  %3594 = vmatpush1.bf16.msra.mxu1 %v5053_v37  ;;  %v5093_v36 = vcombine.low %v609_v21, %v613_v23  ;;  %v5100_v37 = vcombine.high %v616_v29, %v620_v30  ;;  %v660_v21 = vld [vmem:[#allocation6 + $0xe20] sm:$0xff]  ;;  %v657_v23 = vld [vmem:[#allocation6 + $0xe08] sm:$0xff] }
 0x103   :  { %3431 = vmatprep.subr.bf16.mxu0 %v5060_v38  ;;  %3595 = vmatprep.subr.bf16.mxu1 %v5062_v39  ;;  %v5102_v38 = vcombine.high %v617_v31, %v621_v34  ;;  %v624_v39 = vld [vmem:[#allocation6 + $0xd00] sm:$0xff]  ;;  %v665_v34 = vld [vmem:[#allocation6 + $0xe48] sm:$0xff] }
 0x104   :  { %v5108_v47 = vcombine.high %v624_v39, %v628_v40  ;;  %v5107_v55 = vcombine.low %v624_v39, %v628_v40  ;;  %v664_v30 = vld [vmem:[#allocation6 + $0xe40] sm:$0xff] }
 0x105   :  { %v668_v31 = vld [vmem:[#allocation6 + $0xe60] sm:$0xff] }
 0x106   :  { %3432 = vmatpush1.bf16.msra.mxu0 %v5059_v49  ;;  %3596 = vmatpush1.bf16.msra.mxu1 %v5061_v50  ;;  %v632_v49 = vld [vmem:[#allocation6 + $0xd40] sm:$0xff] }
 0x107   :  { %3433 = vmatprep.subr.bf16.mxu0 %v5068_v52  ;;  %3597 = vmatprep.subr.bf16.mxu1 %v5070_v53  ;;  %v636_v50 = vld [vmem:[#allocation6 + $0xd60] sm:$0xff]  ;;  %v633_v52 = vld [vmem:[#allocation6 + $0xd48] sm:$0xff] }
 0x108   :  { %v637_v53 = vld [vmem:[#allocation6 + $0xd68] sm:$0xff]  ;;  %v5116_v57 = vcombine.high %v632_v49, %v636_v50  ;;  %v672_v40 = vld [vmem:[#allocation6 + $0xe80] sm:$0xff] }
 0x109   :  { %v5118_v60 = vcombine.high %v633_v52, %v637_v53 }
 0x10a   :  { %3434 = vmatpush1.bf16.msra.mxu0 %v5067_v63  ;;  %3598 = vmatpush1.bf16.msra.mxu1 %v5069_v1  ;;  %v641_v63 = vld [vmem:[#allocation6 + $0xd88] sm:$0xff] }
 0x10b   :  { %3444 = vmatprep.subr.bf16.mxu0 %v5076_v2  ;;  %3608 = vmatprep.subr.bf16.mxu1 %v5078_v3  ;;  %v645_v1 = vld [vmem:[#allocation6 + $0xda8] sm:$0xff]  ;;  %v5115_v2 = vcombine.low %v632_v49, %v636_v50  ;;  %v5117_v3 = vcombine.low %v633_v52, %v637_v53  ;;  %v680_v50 = vld [vmem:[#allocation6 + $0xec0] sm:$0xff] }
 0x10c   :  { %v5126_v6 = vcombine.high %v641_v63, %v645_v1  ;;  %v684_v52 = vld [vmem:[#allocation6 + $0xee0] sm:$0xff]  ;;  %v681_v53 = vld [vmem:[#allocation6 + $0xec8] sm:$0xff] }
 0x10d   :  { %3436 = vmatmul.mubr.bf16.vlgmr.msra.gmra.mrb[0].mxu0 %v5737_v9  ;;  %3600 = vmatmul.mubr.bf16.vlgmr.msra.gmra.mrb[0].mxu1 %v5737_v9 }
 0x10e   :  { %3445 = vmatpush1.bf16.msra.mxu0 %v5075_v12  ;;  %3609 = vmatpush1.bf16.msra.mxu1 %v5077_v13  ;;  %v653_v12 = vld [vmem:[#allocation6 + $0xde8] sm:$0xff]  ;;  %v5123_v13 = vcombine.low %v640_v61, %v644_v62  ;;  %v688_v62 = vld [vmem:[#allocation6 + $0xf00] sm:$0xff] }
 0x10f   :  { %3446 = vmatprep.subr.bf16.mxu0 %v5084_v15  ;;  %3610 = vmatprep.subr.bf16.mxu1 %v5086_v16  ;;  %v5125_v15 = vcombine.low %v641_v63, %v645_v1  ;;  %v5132_v16 = vcombine.high %v648_v8, %v652_v10  ;;  %v5134_v17 = vcombine.high %v649_v11, %v653_v12  ;;  %v692_v63 = vld [vmem:[#allocation6 + $0xf20] sm:$0xff]  ;;  %v689_v1 = vld [vmem:[#allocation6 + $0xf08] sm:$0xff] }
 0x110   :  { %3476 = vmatprep.mubr.bf16.mxu0 %v5739_v19  ;;  %3640 = vmatprep.mubr.bf16.mxu1 %v5739_v19 }
 0x112   :  { %3447 = vmatpush1.bf16.msra.mxu0 %v5083_v24  ;;  %3611 = vmatpush1.bf16.msra.mxu1 %v5085_v25  ;;  %v661_v24 = vld [vmem:[#allocation6 + $0xe28] sm:$0xff]  ;;  %v5131_v25 = vcombine.low %v648_v8, %v652_v10  ;;  %v5172_v8 = vcombine.high %v688_v62, %v692_v63 }
 0x113   :  { %3448 = vmatprep.subr.bf16.mxu0 %v5092_v26  ;;  %3612 = vmatprep.subr.bf16.mxu1 %v5094_v27  ;;  %v5133_v26 = vcombine.low %v649_v11, %v653_v12  ;;  %v5140_v27 = vcombine.high %v656_v18, %v660_v21  ;;  %v5142_v29 = vcombine.high %v657_v23, %v661_v24  ;;  %v696_v11 = vld [vmem:[#allocation6 + $0xf40] sm:$0xff] }
 0x114   :  { %v700_v12 = vld [vmem:[#allocation6 + $0xf60] sm:$0xff] }
 0x116   :  { %3449 = vmatpush1.bf16.msra.mxu0 %v5091_v35  ;;  %3613 = vmatpush1.bf16.msra.mxu1 %v5093_v36  ;;  %v669_v35 = vld [vmem:[#allocation6 + $0xe68] sm:$0xff]  ;;  %v5139_v36 = vcombine.low %v656_v18, %v660_v21  ;;  %v75_v18 = vld [vmem:[#allocation2 + $0x30] sm:$0xff]  ;;  %v5180_v21 = vcombine.high %v696_v11, %v700_v12 }
 0x117   :  { %3450 = vmatprep.subr.bf16.mxu0 %v5100_v37  ;;  %3614 = vmatprep.subr.bf16.mxu1 %v5102_v38  ;;  %v5141_v37 = vcombine.low %v657_v23, %v661_v24  ;;  %v5148_v38 = vcombine.high %v664_v30, %v668_v31  ;;  %v5150_v39 = vcombine.high %v665_v34, %v669_v35  ;;  %v704_v24 = vld [vmem:[#allocation6 + $0xf80] sm:$0xff] }
 0x11a   :  { %3451 = vmatpush1.bf16.msra.mxu0 %v5099_v44  ;;  %3615 = vmatpush1.bf16.msra.mxu1 %v5101_v45  ;;  %v677_v44 = vld [vmem:[#allocation6 + $0xea8] sm:$0xff]  ;;  %v5147_v45 = vcombine.low %v664_v30, %v668_v31  ;;  %v5179_v31 = vcombine.low %v696_v11, %v700_v12  ;;  %v227_v11 = vld [vmem:[#allocation6 + $0x98] sm:$0xff] }
 0x11b   :  { %3452 = vmatprep.subr.bf16.mxu0 %v5108_v47  ;;  %3616 = vmatprep.subr.bf16.mxu1 %v5110_v48  ;;  %v5149_v47 = vcombine.low %v665_v34, %v669_v35  ;;  %v5156_v48 = vcombine.high %v672_v40, %v676_v41  ;;  %v5158_v49 = vcombine.high %v673_v42, %v677_v44  ;;  %v231_v12 = vld [vmem:[#allocation6 + $0xb8] sm:$0xff] }
 0x11e   :  { %3453 = vmatpush1.bf16.msra.mxu0 %v5107_v55  ;;  %3617 = vmatpush1.bf16.msra.mxu1 %v5109_v56  ;;  %v685_v55 = vld [vmem:[#allocation6 + $0xee8] sm:$0xff]  ;;  %v5155_v56 = vcombine.low %v672_v40, %v676_v41 }
 0x11f   :  { %3454 = vmatprep.subr.bf16.mxu0 %v5116_v57  ;;  %3618 = vmatprep.subr.bf16.mxu1 %v5118_v60  ;;  %v5157_v57 = vcombine.low %v673_v42, %v677_v44  ;;  %v5164_v60 = vcombine.high %v680_v50, %v684_v52  ;;  %v5166_v61 = vcombine.high %v681_v53, %v685_v55 }
 0x122   :  { %3455 = vmatpush1.bf16.msra.mxu0 %v5115_v2  ;;  %3619 = vmatpush1.bf16.msra.mxu1 %v5117_v3  ;;  %v693_v2 = vld [vmem:[#allocation6 + $0xf28] sm:$0xff]  ;;  %v5746_v3 = vsub.s32 6, %v5662_v46 }
 0x123   :  { %3456 = vmatprep.subr.bf16.mxu0 %v5124_v5  ;;  %3620 = vmatprep.subr.bf16.mxu1 %v5126_v6  ;;  %v5163_v5 = vcombine.low %v680_v50, %v684_v52  ;;  %v5165_v6 = vcombine.low %v681_v53, %v685_v55  ;;  %v5174_v10 = vcombine.high %v689_v1, %v693_v2  ;;  %v215_v50 = vld [vmem:[#allocation6 + $0x38] sm:$0xff] }
 0x124   :  { %v5173_v46 = vcombine.low %v689_v1, %v693_v2  ;;  %v171_v30 = vrot.slane %v5669_v4, %v5746_v3 }
 0x126   :  { %3457 = vmatpush1.bf16.msra.mxu0 %v5123_v13  ;;  %3621 = vmatpush1.bf16.msra.mxu1 %v5125_v15  ;;  %v697_v13 = vld [vmem:[#allocation6 + $0xf48] sm:$0xff] }
 0x127   :  { %3458 = vmatprep.subr.bf16.mxu0 %v5132_v16  ;;  %3622 = vmatprep.subr.bf16.mxu1 %v5134_v17  ;;  %v701_v15 = vld [vmem:[#allocation6 + $0xf68] sm:$0xff]  ;;  %v122_v16 = vrot.slane %v5667_v0, %v5746_v3  ;;  %v5171_v17 = vcombine.low %v688_v62, %v692_v63  ;;  %v219_v62 = vld [vmem:[#allocation6 + $0x58] sm:$0xff] }
 0x128   :  { %v5182_v23 = vcombine.high %v697_v13, %v701_v15  ;;  %v5181_v0 = vcombine.low %v697_v13, %v701_v15  ;;  %v223_v63 = vld [vmem:[#allocation6 + $0x78] sm:$0xff] }
 0x129   :  { %v4705_v15 = vcombine.low %v219_v62, %v223_v63 }
 0x12a   :  { %3459 = vmatpush1.bf16.msra.mxu0 %v5131_v25  ;;  %3623 = vmatpush1.bf16.msra.mxu1 %v5133_v26  ;;  %v708_v25 = vld [vmem:[#allocation6 + $0xfa0] sm:$0xff]  ;;  %v705_v26 = vld [vmem:[#allocation6 + $0xf88] sm:$0xff] }
 0x12b   :  { %3460 = vmatprep.subr.bf16.mxu0 %v5140_v27  ;;  %3624 = vmatprep.subr.bf16.mxu1 %v5142_v29  ;;  %v709_v27 = vld [vmem:[#allocation6 + $0xfa8] sm:$0xff]  ;;  %v141_v29 = vmul.f32 %v122_v16, %v75_v18  ;;  %v5188_v34 = vcombine.high %v704_v24, %v708_v25  ;;  %v5187_v41 = vcombine.low %v704_v24, %v708_v25  ;;  %v234_v18 = vld [vmem:[#allocation6 + $0xd0] sm:$0xff] }
 0x12c   :  { %v5190_v35 = vcombine.high %v705_v26, %v709_v27  ;;  %v5189_v42 = vcombine.low %v705_v26, %v709_v27  ;;  %v4713_v25 = vcombine.low %v227_v11, %v231_v12 }
 0x12d   :  { %v190_v40 = vadd.f32 %v171_v30, %v141_v29  ;;  %v242_v29 = vld [vmem:[#allocation6 + $0x110] sm:$0xff] }
 0x12e   :  { %3461 = vmatpush1.bf16.msra.mxu0 %v5139_v36  ;;  %3625 = vmatpush1.bf16.msra.mxu1 %v5141_v37  ;;  %v712_v36 = vld [vmem:[#allocation6 + $0xfc0] sm:$0xff]  ;;  %v246_v30 = vld [vmem:[#allocation6 + $0x130] sm:$0xff] }
 0x12f   :  { %3462 = vmatprep.subr.bf16.mxu0 %v5148_v38  ;;  %3626 = vmatprep.subr.bf16.mxu1 %v5150_v39  ;;  %v716_v37 = vld [vmem:[#allocation6 + $0xfe0] sm:$0xff]  ;;  %v713_v38 = vld [vmem:[#allocation6 + $0xfc8] sm:$0xff] }
 0x130   :  { %v717_v39 = vld [vmem:[#allocation6 + $0xfe8] sm:$0xff]  ;;  %v5196_v44 = vcombine.high %v712_v36, %v716_v37  ;;  %v5195_v52 = vcombine.low %v712_v36, %v716_v37  ;;  %v4728_v36 = vcombine.high %v242_v29, %v246_v30  ;;  %v250_v37 = vld [vmem:[#allocation6 + $0x150] sm:$0xff] }
 0x131   :  { %v5198_v4 = vcombine.high %v713_v38, %v717_v39  ;;  %v5197_v53 = vcombine.low %v713_v38, %v717_v39  ;;  %v254_v38 = vld [vmem:[#allocation6 + $0x170] sm:$0xff]  ;;  %v251_v39 = vld [vmem:[#allocation6 + $0x158] sm:$0xff] }
 0x132   :  { %3463 = vmatpush1.bf16.msra.mxu0 %v5147_v45  ;;  %3627 = vmatpush1.bf16.msra.mxu1 %v5149_v47  ;;  %v210_v45 = vld [vmem:[#allocation6 + $0x10] sm:$0xff] }
 0x133   :  { %3464 = vmatprep.subr.bf16.mxu0 %v5156_v48  ;;  %3628 = vmatprep.subr.bf16.mxu1 %v5158_v49  ;;  %v214_v47 = vld [vmem:[#allocation6 + $0x30] sm:$0xff]  ;;  %v198_v48 = vmax.f32 %v190_v40, 0.0  ;;  %v211_v49 = vld [vmem:[#allocation6 + $0x18] sm:$0xff] }
 0x134   :  { %v4696_v55 = vcombine.high %v210_v45, %v214_v47  ;;  %v4695_v1 = vcombine.low %v210_v45, %v214_v47  ;;  %v4697_v2 = vcombine.low %v211_v49, %v215_v50  ;;  %v255_v40 = vld [vmem:[#allocation6 + $0x178] sm:$0xff]  ;;  %v258_v45 = vld [vmem:[#allocation6 + $0x190] sm:$0xff] }
 0x135   :  { %v262_v47 = vld [vmem:[#allocation6 + $0x1b0] sm:$0xff] }
 0x136   :  { %3465 = vmatpush1.bf16.msra.mxu0 %v5155_v56  ;;  %3629 = vmatpush1.bf16.msra.mxu1 %v5157_v57  ;;  %v4698_v56 = vcombine.high %v211_v49, %v215_v50  ;;  %v218_v57 = vld [vmem:[#allocation6 + $0x50] sm:$0xff]  ;;  %v263_v49 = vld [vmem:[#allocation6 + $0x1b8] sm:$0xff]  ;;  %v4735_v50 = vcombine.low %v250_v37, %v254_v38 }
 0x137   :  { %3466 = vmatprep.subr.bf16.mxu0 %v5164_v60  ;;  %3630 = vmatprep.subr.bf16.mxu1 %v5166_v61  ;;  %v222_v60 = vld [vmem:[#allocation6 + $0x70] sm:$0xff]  ;;  %v5752_v61 = vpack.c.bf16 %v198_v48, %v198_v48  ;;  %v259_v48 = vld [vmem:[#allocation6 + $0x198] sm:$0xff] }
 0x138   :  { %v4703_v13 = vcombine.low %v218_v57, %v222_v60 }
 0x13a   :  { %3467 = vmatpush1.bf16.msra.mxu0 %v5163_v5  ;;  %3631 = vmatpush1.bf16.msra.mxu1 %v5165_v6  ;;  %v4704_v5 = vcombine.high %v218_v57, %v222_v60  ;;  %v4706_v6 = vcombine.high %v219_v62, %v223_v63  ;;  %v270_v57 = vld [vmem:[#allocation6 + $0x1f0] sm:$0xff]  ;;  %v267_v60 = vld [vmem:[#allocation6 + $0x1d8] sm:$0xff]  ;;  %v4743_v63 = vcombine.low %v258_v45, %v262_v47 }
 0x13b   :  { %3468 = vmatprep.subr.bf16.mxu0 %v5172_v8  ;;  %3632 = vmatprep.subr.bf16.mxu1 %v5174_v10  ;;  %v226_v8 = vld [vmem:[#allocation6 + $0x90] sm:$0xff]  ;;  %v271_v62 = vld [vmem:[#allocation6 + $0x1f8] sm:$0xff] }
 0x13c   :  { %v230_v10 = vld [vmem:[#allocation6 + $0xb0] sm:$0xff] }
 0x13d   :  { %v4712_v16 = vcombine.high %v226_v8, %v230_v10  ;;  %v4711_v24 = vcombine.low %v226_v8, %v230_v10  ;;  %v278_v8 = vld [vmem:[#allocation6 + $0x230] sm:$0xff]  ;;  %v275_v10 = vld [vmem:[#allocation6 + $0x218] sm:$0xff] }
 0x13e   :  { %3469 = vmatpush1.bf16.msra.mxu0 %v5171_v17  ;;  %3633 = vmatpush1.bf16.msra.mxu1 %v5173_v46  ;;  %v4714_v17 = vcombine.high %v227_v11, %v231_v12  ;;  %v238_v46 = vld [vmem:[#allocation6 + $0xf0] sm:$0xff]  ;;  %v279_v11 = vld [vmem:[#allocation6 + $0x238] sm:$0xff] }
 0x13f   :  { %3470 = vmatprep.subr.bf16.mxu0 %v5180_v21  ;;  %3634 = vmatprep.subr.bf16.mxu1 %v5182_v23  ;;  %v235_v21 = vld [vmem:[#allocation6 + $0xd8] sm:$0xff]  ;;  %v4720_v26 = vcombine.high %v234_v18, %v238_v46 }
 0x140   :  { %v239_v23 = vld [vmem:[#allocation6 + $0xf8] sm:$0xff] }
 0x141   :  { %v4722_v27 = vcombine.high %v235_v21, %v239_v23 }
 0x142   :  { %3471 = vmatpush1.bf16.msra.mxu0 %v5179_v31  ;;  %3635 = vmatpush1.bf16.msra.mxu1 %v5181_v0  ;;  %v243_v31 = vld [vmem:[#allocation6 + $0x118] sm:$0xff] }
 0x143   :  { %3472 = vmatprep.subr.bf16.mxu0 %v5188_v34  ;;  %3636 = vmatprep.subr.bf16.mxu1 %v5190_v35  ;;  %v247_v0 = vld [vmem:[#allocation6 + $0x138] sm:$0xff]  ;;  %v4719_v34 = vcombine.low %v234_v18, %v238_v46  ;;  %v4721_v35 = vcombine.low %v235_v21, %v239_v23  ;;  %v286_v18 = vld [vmem:[#allocation6 + $0x270] sm:$0xff] }
 0x144   :  { %v283_v46 = vld [vmem:[#allocation6 + $0x258] sm:$0xff] }
 0x145   :  { %v287_v21 = vld [vmem:[#allocation6 + $0x278] sm:$0xff] }
 0x146   :  { %3473 = vmatpush1.bf16.msra.mxu0 %v5187_v41  ;;  %3637 = vmatpush1.bf16.msra.mxu1 %v5189_v42  ;;  %v4727_v41 = vcombine.low %v242_v29, %v246_v30  ;;  %v4729_v42 = vcombine.low %v243_v31, %v247_v0  ;;  %v294_v29 = vld [vmem:[#allocation6 + $0x2b0] sm:$0xff]  ;;  %v291_v30 = vld [vmem:[#allocation6 + $0x298] sm:$0xff] }
 0x147   :  { %3474 = vmatprep.subr.bf16.mxu0 %v5196_v44  ;;  %3638 = vmatprep.subr.bf16.mxu1 %v5198_v4  ;;  %v4736_v44 = vcombine.high %v250_v37, %v254_v38  ;;  %v4738_v4 = vcombine.high %v251_v39, %v255_v40  ;;  %v302_v37 = vld [vmem:[#allocation6 + $0x2f0] sm:$0xff]  ;;  %v299_v38 = vld [vmem:[#allocation6 + $0x2d8] sm:$0xff] }
 0x14a   :  { %3475 = vmatpush1.bf16.msra.mxu0 %v5195_v52  ;;  %3639 = vmatpush1.bf16.msra.mxu1 %v5197_v53  ;;  %v4737_v52 = vcombine.low %v251_v39, %v255_v40  ;;  %v4744_v53 = vcombine.high %v258_v45, %v262_v47  ;;  %v303_v39 = vld [vmem:[#allocation6 + $0x2f8] sm:$0xff]  ;;  %v310_v45 = vld [vmem:[#allocation6 + $0x330] sm:$0xff] }
 0x14b   :  { %3649 = vmatprep.subr.bf16.mxu0 %v4696_v55  ;;  %3813 = vmatprep.subr.bf16.mxu1 %v4698_v56  ;;  %v4746_v55 = vcombine.high %v259_v48, %v263_v49  ;;  %v266_v56 = vld [vmem:[#allocation6 + $0x1d0] sm:$0xff]  ;;  %v307_v47 = vld [vmem:[#allocation6 + $0x318] sm:$0xff] }
 0x14c   :  { %v4751_v12 = vcombine.low %v266_v56, %v270_v57 }
 0x14d   :  { %3477 = vmatmul.mubr.bf16.vlgmr.msra.gmra.mrb[0].mxu0 %v5752_v61  ;;  %3641 = vmatmul.mubr.bf16.vlgmr.msra.gmra.mrb[0].mxu1 %v5752_v61 }
 0x14e   :  { %3650 = vmatpush1.bf16.msra.mxu0 %v4695_v1  ;;  %3814 = vmatpush1.bf16.msra.mxu1 %v4697_v2  ;;  %v4745_v1 = vcombine.low %v259_v48, %v263_v49  ;;  %v4752_v2 = vcombine.high %v266_v56, %v270_v57  ;;  %v311_v48 = vld [vmem:[#allocation6 + $0x338] sm:$0xff]  ;;  %v318_v56 = vld [vmem:[#allocation6 + $0x370] sm:$0xff] }
 0x14f   :  { %3651 = vmatprep.subr.bf16.mxu0 %v4704_v5  ;;  %3815 = vmatprep.subr.bf16.mxu1 %v4706_v6  ;;  %v4754_v5 = vcombine.high %v267_v60, %v271_v62  ;;  %v274_v6 = vld [vmem:[#allocation6 + $0x210] sm:$0xff]  ;;  %v315_v57 = vld [vmem:[#allocation6 + $0x358] sm:$0xff] }
 0x150   :  { %3681 = vmatprep.mubr.bf16.mxu0 %v5675_v28  ;;  %3845 = vmatprep.mubr.bf16.mxu1 %v5675_v28  ;;  %v4730_v28 = vcombine.high %v243_v31, %v247_v0  ;;  %v4759_v23 = vcombine.low %v274_v6, %v278_v8  ;;  %v295_v31 = vld [vmem:[#allocation6 + $0x2b8] sm:$0xff] }
 0x152   :  { %3652 = vmatpush1.bf16.msra.mxu0 %v4703_v13  ;;  %3816 = vmatpush1.bf16.msra.mxu1 %v4705_v15  ;;  %v4753_v13 = vcombine.low %v267_v60, %v271_v62  ;;  %v4760_v15 = vcombine.high %v274_v6, %v278_v8  ;;  %v319_v60 = vld [vmem:[#allocation6 + $0x378] sm:$0xff]  ;;  %v326_v6 = vld [vmem:[#allocation6 + $0x3b0] sm:$0xff] }
 0x153   :  { %3653 = vmatprep.subr.bf16.mxu0 %v4712_v16  ;;  %3817 = vmatprep.subr.bf16.mxu1 %v4714_v17  ;;  %v4762_v16 = vcombine.high %v275_v10, %v279_v11  ;;  %v282_v17 = vld [vmem:[#allocation6 + $0x250] sm:$0xff]  ;;  %v323_v8 = vld [vmem:[#allocation6 + $0x398] sm:$0xff] }
 0x154   :  { %v4767_v0 = vcombine.low %v282_v17, %v286_v18 }
 0x156   :  { %3654 = vmatpush1.bf16.msra.mxu0 %v4711_v24  ;;  %3818 = vmatpush1.bf16.msra.mxu1 %v4713_v25  ;;  %v4761_v24 = vcombine.low %v275_v10, %v279_v11  ;;  %v4768_v25 = vcombine.high %v282_v17, %v286_v18  ;;  %v327_v10 = vld [vmem:[#allocation6 + $0x3b8] sm:$0xff]  ;;  %v334_v17 = vld [vmem:[#allocation6 + $0x3f0] sm:$0xff] }
 0x157   :  { %3655 = vmatprep.subr.bf16.mxu0 %v4720_v26  ;;  %3819 = vmatprep.subr.bf16.mxu1 %v4722_v27  ;;  %v4770_v26 = vcombine.high %v283_v46, %v287_v21  ;;  %v290_v27 = vld [vmem:[#allocation6 + $0x290] sm:$0xff]  ;;  %v331_v18 = vld [vmem:[#allocation6 + $0x3d8] sm:$0xff] }
 0x158   :  { %v4775_v40 = vcombine.low %v290_v27, %v294_v29 }
 0x15a   :  { %3656 = vmatpush1.bf16.msra.mxu0 %v4719_v34  ;;  %3820 = vmatpush1.bf16.msra.mxu1 %v4721_v35  ;;  %v4769_v34 = vcombine.low %v283_v46, %v287_v21  ;;  %v4776_v35 = vcombine.high %v290_v27, %v294_v29  ;;  %v335_v46 = vld [vmem:[#allocation6 + $0x3f8] sm:$0xff]  ;;  %v342_v27 = vld [vmem:[#allocation6 + $0x430] sm:$0xff] }
 0x15b   :  { %3657 = vmatprep.subr.bf16.mxu0 %v4728_v36  ;;  %3821 = vmatprep.subr.bf16.mxu1 %v4730_v28  ;;  %v4778_v36 = vcombine.high %v291_v30, %v295_v31  ;;  %v298_v28 = vld [vmem:[#allocation6 + $0x2d0] sm:$0xff]  ;;  %v339_v29 = vld [vmem:[#allocation6 + $0x418] sm:$0xff] }
 0x15c   :  { %v4783_v49 = vcombine.low %v298_v28, %v302_v37 }
 0x15e   :  { %3658 = vmatpush1.bf16.msra.mxu0 %v4727_v41  ;;  %3822 = vmatpush1.bf16.msra.mxu1 %v4729_v42  ;;  %v4777_v41 = vcombine.low %v291_v30, %v295_v31  ;;  %v4784_v42 = vcombine.high %v298_v28, %v302_v37  ;;  %v343_v30 = vld [vmem:[#allocation6 + $0x438] sm:$0xff]  ;;  %v350_v28 = vld [vmem:[#allocation6 + $0x470] sm:$0xff] }
 0x15f   :  { %3659 = vmatprep.subr.bf16.mxu0 %v4736_v44  ;;  %3823 = vmatprep.subr.bf16.mxu1 %v4738_v4  ;;  %v4786_v44 = vcombine.high %v299_v38, %v303_v39  ;;  %v306_v4 = vld [vmem:[#allocation6 + $0x310] sm:$0xff]  ;;  %v347_v37 = vld [vmem:[#allocation6 + $0x458] sm:$0xff] }
 0x160   :  { %v4791_v62 = vcombine.low %v306_v4, %v310_v45 }
 0x162   :  { %3660 = vmatpush1.bf16.msra.mxu0 %v4735_v50  ;;  %3824 = vmatpush1.bf16.msra.mxu1 %v4737_v52  ;;  %v4785_v50 = vcombine.low %v299_v38, %v303_v39  ;;  %v4792_v52 = vcombine.high %v306_v4, %v310_v45  ;;  %v351_v38 = vld [vmem:[#allocation6 + $0x478] sm:$0xff]  ;;  %v358_v4 = vld [vmem:[#allocation6 + $0x4b0] sm:$0xff] }
 0x163   :  { %3661 = vmatprep.subr.bf16.mxu0 %v4744_v53  ;;  %3825 = vmatprep.subr.bf16.mxu1 %v4746_v55  ;;  %v4794_v53 = vcombine.high %v307_v47, %v311_v48  ;;  %v314_v55 = vld [vmem:[#allocation6 + $0x350] sm:$0xff]  ;;  %v355_v45 = vld [vmem:[#allocation6 + $0x498] sm:$0xff] }
 0x164   :  { %v4799_v11 = vcombine.low %v314_v55, %v318_v56 }
 0x166   :  { %3662 = vmatpush1.bf16.msra.mxu0 %v4743_v63  ;;  %3826 = vmatpush1.bf16.msra.mxu1 %v4745_v1  ;;  %v4793_v63 = vcombine.low %v307_v47, %v311_v48  ;;  %v4800_v1 = vcombine.high %v314_v55, %v318_v56  ;;  %v359_v47 = vld [vmem:[#allocation6 + $0x4b8] sm:$0xff]  ;;  %v366_v55 = vld [vmem:[#allocation6 + $0x4f0] sm:$0xff] }
 0x167   :  { %3663 = vmatprep.subr.bf16.mxu0 %v4752_v2  ;;  %3827 = vmatprep.subr.bf16.mxu1 %v4754_v5  ;;  %v4802_v2 = vcombine.high %v315_v57, %v319_v60  ;;  %v322_v5 = vld [vmem:[#allocation6 + $0x390] sm:$0xff]  ;;  %v363_v56 = vld [vmem:[#allocation6 + $0x4d8] sm:$0xff] }
 0x168   :  { %v4807_v21 = vcombine.low %v322_v5, %v326_v6 }
 0x16a   :  { %3664 = vmatpush1.bf16.msra.mxu0 %v4751_v12  ;;  %3828 = vmatpush1.bf16.msra.mxu1 %v4753_v13  ;;  %v4801_v12 = vcombine.low %v315_v57, %v319_v60  ;;  %v4808_v13 = vcombine.high %v322_v5, %v326_v6  ;;  %v367_v57 = vld [vmem:[#allocation6 + $0x4f8] sm:$0xff] }
 0x16b   :  { %3665 = vmatprep.subr.bf16.mxu0 %v4760_v15  ;;  %3829 = vmatprep.subr.bf16.mxu1 %v4762_v16  ;;  %v4810_v15 = vcombine.high %v323_v8, %v327_v10  ;;  %v330_v16 = vld [vmem:[#allocation6 + $0x3d0] sm:$0xff]  ;;  %v371_v5 = vld [vmem:[#allocation6 + $0x518] sm:$0xff] }
 0x16c   :  { %v4815_v31 = vcombine.low %v330_v16, %v334_v17  ;;  %v375_v6 = vld [vmem:[#allocation6 + $0x538] sm:$0xff] }
 0x16e   :  { %3666 = vmatpush1.bf16.msra.mxu0 %v4759_v23  ;;  %3830 = vmatpush1.bf16.msra.mxu1 %v4761_v24  ;;  %v4809_v23 = vcombine.low %v323_v8, %v327_v10  ;;  %v4816_v24 = vcombine.high %v330_v16, %v334_v17  ;;  %v4849_v10 = vcombine.low %v363_v56, %v367_v57  ;;  %v383_v16 = vld [vmem:[#allocation6 + $0x578] sm:$0xff] }
 0x16f   :  { %3667 = vmatprep.subr.bf16.mxu0 %v4768_v25  ;;  %3831 = vmatprep.subr.bf16.mxu1 %v4770_v26  ;;  %v4818_v25 = vcombine.high %v331_v18, %v335_v46  ;;  %v338_v26 = vld [vmem:[#allocation6 + $0x410] sm:$0xff] }
 0x170   :  { %v4823_v39 = vcombine.low %v338_v26, %v342_v27 }
 0x172   :  { %3668 = vmatpush1.bf16.msra.mxu0 %v4767_v0  ;;  %3832 = vmatpush1.bf16.msra.mxu1 %v4769_v34  ;;  %v4817_v0 = vcombine.low %v331_v18, %v335_v46  ;;  %v4824_v34 = vcombine.high %v338_v26, %v342_v27  ;;  %v4857_v18 = vcombine.low %v371_v5, %v375_v6  ;;  %v391_v26 = vld [vmem:[#allocation6 + $0x5b8] sm:$0xff] }
 0x173   :  { %3669 = vmatprep.subr.bf16.mxu0 %v4776_v35  ;;  %3833 = vmatprep.subr.bf16.mxu1 %v4778_v36  ;;  %v4826_v35 = vcombine.high %v339_v29, %v343_v30  ;;  %v346_v36 = vld [vmem:[#allocation6 + $0x450] sm:$0xff] }
 0x174   :  { %v4831_v48 = vcombine.low %v346_v36, %v350_v28 }
 0x176   :  { %3670 = vmatpush1.bf16.msra.mxu0 %v4775_v40  ;;  %3834 = vmatpush1.bf16.msra.mxu1 %v4777_v41  ;;  %v4825_v40 = vcombine.low %v339_v29, %v343_v30  ;;  %v4832_v41 = vcombine.high %v346_v36, %v350_v28  ;;  %v399_v36 = vld [vmem:[#allocation6 + $0x5f8] sm:$0xff] }
 0x177   :  { %3671 = vmatprep.subr.bf16.mxu0 %v4784_v42  ;;  %3835 = vmatprep.subr.bf16.mxu1 %v4786_v44  ;;  %v4834_v42 = vcombine.high %v347_v37, %v351_v38  ;;  %v354_v44 = vld [vmem:[#allocation6 + $0x490] sm:$0xff] }
 0x178   :  { %v4839_v60 = vcombine.low %v354_v44, %v358_v4 }
 0x17a   :  { %3672 = vmatpush1.bf16.msra.mxu0 %v4783_v49  ;;  %3836 = vmatpush1.bf16.msra.mxu1 %v4785_v50  ;;  %v4833_v49 = vcombine.low %v347_v37, %v351_v38  ;;  %v4840_v50 = vcombine.high %v354_v44, %v358_v4  ;;  %v407_v44 = vld [vmem:[#allocation6 + $0x638] sm:$0xff] }
 0x17b   :  { %3673 = vmatprep.subr.bf16.mxu0 %v4792_v52  ;;  %3837 = vmatprep.subr.bf16.mxu1 %v4794_v53  ;;  %v4842_v52 = vcombine.high %v355_v45, %v359_v47  ;;  %v362_v53 = vld [vmem:[#allocation6 + $0x4d0] sm:$0xff] }
 0x17c   :  { %v4847_v8 = vcombine.low %v362_v53, %v366_v55 }
 0x17e   :  { %3674 = vmatpush1.bf16.msra.mxu0 %v4791_v62  ;;  %3838 = vmatpush1.bf16.msra.mxu1 %v4793_v63  ;;  %v4848_v62 = vcombine.high %v362_v53, %v366_v55  ;;  %v4850_v63 = vcombine.high %v363_v56, %v367_v57  ;;  %v415_v53 = vld [vmem:[#allocation6 + $0x678] sm:$0xff] }
 0x17f   :  { %3675 = vmatprep.subr.bf16.mxu0 %v4800_v1  ;;  %3839 = vmatprep.subr.bf16.mxu1 %v4802_v2  ;;  %v370_v1 = vld [vmem:[#allocation6 + $0x510] sm:$0xff] }
 0x180   :  { %v374_v2 = vld [vmem:[#allocation6 + $0x530] sm:$0xff] }
 0x181   :  { %v4855_v17 = vcombine.low %v370_v1, %v374_v2 }
 0x182   :  { %3676 = vmatpush1.bf16.msra.mxu0 %v4799_v11  ;;  %3840 = vmatpush1.bf16.msra.mxu1 %v4801_v12  ;;  %v4856_v11 = vcombine.high %v370_v1, %v374_v2  ;;  %v378_v12 = vld [vmem:[#allocation6 + $0x550] sm:$0xff]  ;;  %v423_v1 = vld [vmem:[#allocation6 + $0x6b8] sm:$0xff] }
 0x183   :  { %3677 = vmatprep.subr.bf16.mxu0 %v4808_v13  ;;  %3841 = vmatprep.subr.bf16.mxu1 %v4810_v15  ;;  %v382_v13 = vld [vmem:[#allocation6 + $0x570] sm:$0xff]  ;;  %v379_v15 = vld [vmem:[#allocation6 + $0x558] sm:$0xff] }
 0x184   :  { %v4864_v46 = vcombine.high %v378_v12, %v382_v13  ;;  %v4863_v27 = vcombine.low %v378_v12, %v382_v13  ;;  %v4865_v29 = vcombine.low %v379_v15, %v383_v16  ;;  %v431_v12 = vld [vmem:[#allocation6 + $0x6f8] sm:$0xff] }
 0x186   :  { %3678 = vmatpush1.bf16.msra.mxu0 %v4807_v21  ;;  %3842 = vmatpush1.bf16.msra.mxu1 %v4809_v23  ;;  %v4866_v21 = vcombine.high %v379_v15, %v383_v16  ;;  %v386_v23 = vld [vmem:[#allocation6 + $0x590] sm:$0xff] }
 0x187   :  { %3679 = vmatprep.subr.bf16.mxu0 %v4816_v24  ;;  %3843 = vmatprep.subr.bf16.mxu1 %v4818_v25  ;;  %v390_v24 = vld [vmem:[#allocation6 + $0x5b0] sm:$0xff]  ;;  %v387_v25 = vld [vmem:[#allocation6 + $0x598] sm:$0xff] }
 0x188   :  { %v4872_v30 = vcombine.high %v386_v23, %v390_v24  ;;  %v4871_v28 = vcombine.low %v386_v23, %v390_v24  ;;  %v4873_v37 = vcombine.low %v387_v25, %v391_v26  ;;  %v439_v23 = vld [vmem:[#allocation6 + $0x738] sm:$0xff] }
 0x18a   :  { %3680 = vmatpush1.bf16.msra.mxu0 %v4815_v31  ;;  %3844 = vmatpush1.bf16.msra.mxu1 %v4817_v0  ;;  %v4874_v31 = vcombine.high %v387_v25, %v391_v26  ;;  %v394_v0 = vld [vmem:[#allocation6 + $0x5d0] sm:$0xff] }
 0x18b   :  { %3690 = vmatprep.subr.bf16.mxu0 %v4824_v34  ;;  %3854 = vmatprep.subr.bf16.mxu1 %v4826_v35  ;;  %v398_v34 = vld [vmem:[#allocation6 + $0x5f0] sm:$0xff]  ;;  %v395_v35 = vld [vmem:[#allocation6 + $0x5d8] sm:$0xff] }
 0x18c   :  { %v4880_v38 = vcombine.high %v394_v0, %v398_v34  ;;  %v4879_v4 = vcombine.low %v394_v0, %v398_v34  ;;  %v447_v0 = vld [vmem:[#allocation6 + $0x778] sm:$0xff] }
 0x18d   :  { %3682 = vmatmul.mubr.bf16.vlgmr.msra.gmra.mrb[4].mxu0 %v5693_v43  ;;  %3846 = vmatmul.mubr.bf16.vlgmr.msra.gmra.mrb[4].mxu1 %v5693_v43  ;;  %v4841_v43 = vcombine.low %v355_v45, %v359_v47  ;;  %v4881_v45 = vcombine.low %v395_v35, %v399_v36 }
 0x18e   :  { %3691 = vmatpush1.bf16.msra.mxu0 %v4823_v39  ;;  %3855 = vmatpush1.bf16.msra.mxu1 %v4825_v40  ;;  %v4882_v39 = vcombine.high %v395_v35, %v399_v36  ;;  %v402_v40 = vld [vmem:[#allocation6 + $0x610] sm:$0xff] }
 0x18f   :  { %3692 = vmatprep.subr.bf16.mxu0 %v4832_v41  ;;  %3856 = vmatprep.subr.bf16.mxu1 %v4834_v42  ;;  %v406_v41 = vld [vmem:[#allocation6 + $0x630] sm:$0xff]  ;;  %v403_v42 = vld [vmem:[#allocation6 + $0x618] sm:$0xff] }
 0x190   :  { %3722 = vmatprep.mubr.bf16.mxu0 %v5695_v54  ;;  %3886 = vmatprep.mubr.bf16.mxu1 %v5695_v54  ;;  %v4858_v54 = vcombine.high %v371_v5, %v375_v6  ;;  %v4888_v47 = vcombine.high %v402_v40, %v406_v41  ;;  %v4887_v55 = vcombine.low %v402_v40, %v406_v41  ;;  %v455_v40 = vld [vmem:[#allocation6 + $0x7b8] sm:$0xff] }
 0x191   :  { %v4889_v56 = vcombine.low %v403_v42, %v407_v44 }
 0x192   :  { %3693 = vmatpush1.bf16.msra.mxu0 %v4831_v48  ;;  %3857 = vmatpush1.bf16.msra.mxu1 %v4833_v49  ;;  %v4890_v48 = vcombine.high %v403_v42, %v407_v44  ;;  %v410_v49 = vld [vmem:[#allocation6 + $0x650] sm:$0xff] }
 0x193   :  { %3694 = vmatprep.subr.bf16.mxu0 %v4840_v50  ;;  %3858 = vmatprep.subr.bf16.mxu1 %v4842_v52  ;;  %v414_v50 = vld [vmem:[#allocation6 + $0x670] sm:$0xff]  ;;  %v411_v52 = vld [vmem:[#allocation6 + $0x658] sm:$0xff] }
 0x194   :  { %v4896_v57 = vcombine.high %v410_v49, %v414_v50  ;;  %v4895_v2 = vcombine.low %v410_v49, %v414_v50  ;;  %v4897_v5 = vcombine.low %v411_v52, %v415_v53  ;;  %v463_v49 = vld [vmem:[#allocation6 + $0x7f8] sm:$0xff] }
 0x196   :  { %3695 = vmatpush1.bf16.msra.mxu0 %v4839_v60  ;;  %3859 = vmatpush1.bf16.msra.mxu1 %v4841_v43  ;;  %v4898_v60 = vcombine.high %v411_v52, %v415_v53  ;;  %v418_v43 = vld [vmem:[#allocation6 + $0x690] sm:$0xff] }
 0x197   :  { %3696 = vmatprep.subr.bf16.mxu0 %v4848_v62  ;;  %3860 = vmatprep.subr.bf16.mxu1 %v4850_v63  ;;  %v422_v62 = vld [vmem:[#allocation6 + $0x6b0] sm:$0xff]  ;;  %v419_v63 = vld [vmem:[#allocation6 + $0x698] sm:$0xff] }
 0x198   :  { %v4904_v6 = vcombine.high %v418_v43, %v422_v62  ;;  %v4903_v13 = vcombine.low %v418_v43, %v422_v62  ;;  %v4905_v15 = vcombine.low %v419_v63, %v423_v1  ;;  %v471_v43 = vld [vmem:[#allocation6 + $0x838] sm:$0xff] }
 0x19a   :  { %3697 = vmatpush1.bf16.msra.mxu0 %v4847_v8  ;;  %3861 = vmatpush1.bf16.msra.mxu1 %v4849_v10  ;;  %v4906_v8 = vcombine.high %v419_v63, %v423_v1  ;;  %v426_v10 = vld [vmem:[#allocation6 + $0x6d0] sm:$0xff] }
 0x19b   :  { %3698 = vmatprep.subr.bf16.mxu0 %v4856_v11  ;;  %3862 = vmatprep.subr.bf16.mxu1 %v4858_v54  ;;  %v430_v11 = vld [vmem:[#allocation6 + $0x6f0] sm:$0xff]  ;;  %v427_v54 = vld [vmem:[#allocation6 + $0x6d8] sm:$0xff] }
 0x19c   :  { %v4912_v16 = vcombine.high %v426_v10, %v430_v11  ;;  %v4911_v24 = vcombine.low %v426_v10, %v430_v11  ;;  %v4913_v25 = vcombine.low %v427_v54, %v431_v12  ;;  %v479_v10 = vld [vmem:[#allocation6 + $0x878] sm:$0xff] }
 0x19e   :  { %3699 = vmatpush1.bf16.msra.mxu0 %v4855_v17  ;;  %3863 = vmatpush1.bf16.msra.mxu1 %v4857_v18  ;;  %v4914_v17 = vcombine.high %v427_v54, %v431_v12  ;;  %v434_v18 = vld [vmem:[#allocation6 + $0x710] sm:$0xff] }
 0x19f   :  { %3700 = vmatprep.subr.bf16.mxu0 %v4864_v46  ;;  %3864 = vmatprep.subr.bf16.mxu1 %v4866_v21  ;;  %v438_v46 = vld [vmem:[#allocation6 + $0x730] sm:$0xff]  ;;  %v435_v21 = vld [vmem:[#allocation6 + $0x718] sm:$0xff] }
 0x1a0   :  { %v4920_v26 = vcombine.high %v434_v18, %v438_v46  ;;  %v4919_v34 = vcombine.low %v434_v18, %v438_v46  ;;  %v4921_v35 = vcombine.low %v435_v21, %v439_v23  ;;  %v487_v18 = vld [vmem:[#allocation6 + $0x8b8] sm:$0xff] }
 0x1a2   :  { %3701 = vmatpush1.bf16.msra.mxu0 %v4863_v27  ;;  %3865 = vmatpush1.bf16.msra.mxu1 %v4865_v29  ;;  %v4922_v27 = vcombine.high %v435_v21, %v439_v23  ;;  %v442_v29 = vld [vmem:[#allocation6 + $0x750] sm:$0xff] }
 0x1a3   :  { %3702 = vmatprep.subr.bf16.mxu0 %v4872_v30  ;;  %3866 = vmatprep.subr.bf16.mxu1 %v4874_v31  ;;  %v446_v30 = vld [vmem:[#allocation6 + $0x770] sm:$0xff]  ;;  %v443_v31 = vld [vmem:[#allocation6 + $0x758] sm:$0xff] }
 0x1a4   :  { %v4928_v36 = vcombine.high %v442_v29, %v446_v30  ;;  %v4927_v41 = vcombine.low %v442_v29, %v446_v30  ;;  %v4929_v42 = vcombine.low %v443_v31, %v447_v0  ;;  %v495_v29 = vld [vmem:[#allocation6 + $0x8f8] sm:$0xff] }
 0x1a6   :  { %3703 = vmatpush1.bf16.msra.mxu0 %v4871_v28  ;;  %3867 = vmatpush1.bf16.msra.mxu1 %v4873_v37  ;;  %v4930_v28 = vcombine.high %v443_v31, %v447_v0  ;;  %v450_v37 = vld [vmem:[#allocation6 + $0x790] sm:$0xff] }
 0x1a7   :  { %3704 = vmatprep.subr.bf16.mxu0 %v4880_v38  ;;  %3868 = vmatprep.subr.bf16.mxu1 %v4882_v39  ;;  %v454_v38 = vld [vmem:[#allocation6 + $0x7b0] sm:$0xff]  ;;  %v451_v39 = vld [vmem:[#allocation6 + $0x798] sm:$0xff] }
 0x1a8   :  { %v4936_v44 = vcombine.high %v450_v37, %v454_v38  ;;  %v4935_v50 = vcombine.low %v450_v37, %v454_v38  ;;  %v4937_v52 = vcombine.low %v451_v39, %v455_v40 }
 0x1aa   :  { %3705 = vmatpush1.bf16.msra.mxu0 %v4879_v4  ;;  %3869 = vmatpush1.bf16.msra.mxu1 %v4881_v45  ;;  %v4938_v4 = vcombine.high %v451_v39, %v455_v40  ;;  %v458_v45 = vld [vmem:[#allocation6 + $0x7d0] sm:$0xff] }
 0x1ab   :  { %3706 = vmatprep.subr.bf16.mxu0 %v4888_v47  ;;  %3870 = vmatprep.subr.bf16.mxu1 %v4890_v48  ;;  %v462_v47 = vld [vmem:[#allocation6 + $0x7f0] sm:$0xff]  ;;  %v459_v48 = vld [vmem:[#allocation6 + $0x7d8] sm:$0xff] }
 0x1ac   :  { %v4944_v53 = vcombine.high %v458_v45, %v462_v47  ;;  %v4943_v62 = vcombine.low %v458_v45, %v462_v47  ;;  %v4945_v63 = vcombine.low %v459_v48, %v463_v49  ;;  %v506_v40 = vld [vmem:[#allocation6 + $0x950] sm:$0xff] }
 0x1ae   :  { %3707 = vmatpush1.bf16.msra.mxu0 %v4887_v55  ;;  %3871 = vmatpush1.bf16.msra.mxu1 %v4889_v56  ;;  %v4946_v55 = vcombine.high %v459_v48, %v463_v49  ;;  %v466_v56 = vld [vmem:[#allocation6 + $0x810] sm:$0xff] }
 0x1af   :  { %3708 = vmatprep.subr.bf16.mxu0 %v4896_v57  ;;  %3872 = vmatprep.subr.bf16.mxu1 %v4898_v60  ;;  %v470_v57 = vld [vmem:[#allocation6 + $0x830] sm:$0xff]  ;;  %v467_v60 = vld [vmem:[#allocation6 + $0x818] sm:$0xff] }
 0x1b0   :  { %v4952_v1 = vcombine.high %v466_v56, %v470_v57  ;;  %v4951_v11 = vcombine.low %v466_v56, %v470_v57  ;;  %v4953_v54 = vcombine.low %v467_v60, %v471_v43  ;;  %v514_v49 = vld [vmem:[#allocation6 + $0x990] sm:$0xff] }
 0x1b2   :  { %3709 = vmatpush1.bf16.msra.mxu0 %v4895_v2  ;;  %3873 = vmatpush1.bf16.msra.mxu1 %v4897_v5  ;;  %v4954_v2 = vcombine.high %v467_v60, %v471_v43  ;;  %v474_v5 = vld [vmem:[#allocation6 + $0x850] sm:$0xff] }
 0x1b3   :  { %3710 = vmatprep.subr.bf16.mxu0 %v4904_v6  ;;  %3874 = vmatprep.subr.bf16.mxu1 %v4906_v8  ;;  %v478_v6 = vld [vmem:[#allocation6 + $0x870] sm:$0xff]  ;;  %v475_v8 = vld [vmem:[#allocation6 + $0x858] sm:$0xff] }
 0x1b4   :  { %v4960_v12 = vcombine.high %v474_v5, %v478_v6  ;;  %v4959_v46 = vcombine.low %v474_v5, %v478_v6  ;;  %v4961_v21 = vcombine.low %v475_v8, %v479_v10  ;;  %v522_v43 = vld [vmem:[#allocation6 + $0x9d0] sm:$0xff] }
 0x1b6   :  { %3711 = vmatpush1.bf16.msra.mxu0 %v4903_v13  ;;  %3875 = vmatpush1.bf16.msra.mxu1 %v4905_v15  ;;  %v4962_v13 = vcombine.high %v475_v8, %v479_v10  ;;  %v482_v15 = vld [vmem:[#allocation6 + $0x890] sm:$0xff] }
 0x1b7   :  { %3712 = vmatprep.subr.bf16.mxu0 %v4912_v16  ;;  %3876 = vmatprep.subr.bf16.mxu1 %v4914_v17  ;;  %v486_v16 = vld [vmem:[#allocation6 + $0x8b0] sm:$0xff]  ;;  %v483_v17 = vld [vmem:[#allocation6 + $0x898] sm:$0xff] }
 0x1b8   :  { %v4968_v23 = vcombine.high %v482_v15, %v486_v16  ;;  %v4967_v30 = vcombine.low %v482_v15, %v486_v16  ;;  %v530_v10 = vld [vmem:[#allocation6 + $0xa10] sm:$0xff] }
 0x1ba   :  { %3713 = vmatpush1.bf16.msra.mxu0 %v4911_v24  ;;  %3877 = vmatpush1.bf16.msra.mxu1 %v4913_v25  ;;  %v4970_v24 = vcombine.high %v483_v17, %v487_v18  ;;  %v490_v25 = vld [vmem:[#allocation6 + $0x8d0] sm:$0xff] }
 0x1bb   :  { %3714 = vmatprep.subr.bf16.mxu0 %v4920_v26  ;;  %3878 = vmatprep.subr.bf16.mxu1 %v4922_v27  ;;  %v494_v26 = vld [vmem:[#allocation6 + $0x8f0] sm:$0xff]  ;;  %v491_v27 = vld [vmem:[#allocation6 + $0x8d8] sm:$0xff] }
 0x1bc   :  { %v4976_v31 = vcombine.high %v490_v25, %v494_v26  ;;  %v4978_v0 = vcombine.high %v491_v27, %v495_v29  ;;  %v4975_v37 = vcombine.low %v490_v25, %v494_v26  ;;  %v4977_v38 = vcombine.low %v491_v27, %v495_v29  ;;  %v546_v29 = vld [vmem:[#allocation6 + $0xa90] sm:$0xff] }
 0x1be   :  { %3715 = vmatpush1.bf16.msra.mxu0 %v4919_v34  ;;  %3879 = vmatpush1.bf16.msra.mxu1 %v4921_v35  ;;  %v498_v34 = vld [vmem:[#allocation6 + $0x910] sm:$0xff] }
 0x1bf   :  { %3716 = vmatprep.subr.bf16.mxu0 %v4928_v36  ;;  %3880 = vmatprep.subr.bf16.mxu1 %v4930_v28  ;;  %v502_v35 = vld [vmem:[#allocation6 + $0x930] sm:$0xff]  ;;  %v499_v36 = vld [vmem:[#allocation6 + $0x918] sm:$0xff] }
 0x1c0   :  { %v503_v28 = vld [vmem:[#allocation6 + $0x938] sm:$0xff]  ;;  %v4984_v39 = vcombine.high %v498_v34, %v502_v35 }
 0x1c1   :  { %v4985_v45 = vcombine.low %v499_v36, %v503_v28 }
 0x1c2   :  { %3717 = vmatpush1.bf16.msra.mxu0 %v4927_v41  ;;  %3881 = vmatpush1.bf16.msra.mxu1 %v4929_v42  ;;  %v510_v41 = vld [vmem:[#allocation6 + $0x970] sm:$0xff]  ;;  %v507_v42 = vld [vmem:[#allocation6 + $0x958] sm:$0xff] }
 0x1c3   :  { %3718 = vmatprep.subr.bf16.mxu0 %v4936_v44  ;;  %3882 = vmatprep.subr.bf16.mxu1 %v4938_v4  ;;  %v511_v44 = vld [vmem:[#allocation6 + $0x978] sm:$0xff]  ;;  %v4983_v4 = vcombine.low %v498_v34, %v502_v35  ;;  %v4992_v47 = vcombine.high %v506_v40, %v510_v41 }
 0x1c4   :  { %v4994_v48 = vcombine.high %v507_v42, %v511_v44  ;;  %v4993_v56 = vcombine.low %v507_v42, %v511_v44  ;;  %v562_v44 = vld [vmem:[#allocation6 + $0xb10] sm:$0xff] }
 0x1c6   :  { %3719 = vmatpush1.bf16.msra.mxu0 %v4935_v50  ;;  %3883 = vmatpush1.bf16.msra.mxu1 %v4937_v52  ;;  %v518_v50 = vld [vmem:[#allocation6 + $0x9b0] sm:$0xff]  ;;  %v515_v52 = vld [vmem:[#allocation6 + $0x998] sm:$0xff] }
 0x1c7   :  { %3720 = vmatprep.subr.bf16.mxu0 %v4944_v53  ;;  %3884 = vmatprep.subr.bf16.mxu1 %v4946_v55  ;;  %v519_v53 = vld [vmem:[#allocation6 + $0x9b8] sm:$0xff]  ;;  %v4991_v55 = vcombine.low %v506_v40, %v510_v41  ;;  %v5000_v57 = vcombine.high %v514_v49, %v518_v50 }
 0x1c8   :  { %v5002_v60 = vcombine.high %v515_v52, %v519_v53  ;;  %v5001_v5 = vcombine.low %v515_v52, %v519_v53  ;;  %v570_v53 = vld [vmem:[#allocation6 + $0xb50] sm:$0xff] }
 0x1ca   :  { %3721 = vmatpush1.bf16.msra.mxu0 %v4943_v62  ;;  %3885 = vmatpush1.bf16.msra.mxu1 %v4945_v63  ;;  %v526_v62 = vld [vmem:[#allocation6 + $0x9f0] sm:$0xff]  ;;  %v523_v63 = vld [vmem:[#allocation6 + $0x9d8] sm:$0xff] }
 0x1cb   :  { %3731 = vmatprep.subr.bf16.mxu0 %v4952_v1  ;;  %3895 = vmatprep.subr.bf16.mxu1 %v4954_v2  ;;  %v527_v1 = vld [vmem:[#allocation6 + $0x9f8] sm:$0xff]  ;;  %v4999_v2 = vcombine.low %v514_v49, %v518_v50  ;;  %v5008_v6 = vcombine.high %v522_v43, %v526_v62 }
 0x1cc   :  { %v5010_v8 = vcombine.high %v523_v63, %v527_v1  ;;  %v5009_v15 = vcombine.low %v523_v63, %v527_v1  ;;  %v578_v1 = vld [vmem:[#allocation6 + $0xb90] sm:$0xff] }
 0x1cd   :  { %3723 = vmatmul.mubr.bf16.vlgmr.msra.gmra.mrb[4].mxu0 %v5715_v20  ;;  %3887 = vmatmul.mubr.bf16.vlgmr.msra.gmra.mrb[4].mxu1 %v5715_v20  ;;  %v4969_v20 = vcombine.low %v483_v17, %v487_v18  ;;  %v538_v18 = vld [vmem:[#allocation6 + $0xa50] sm:$0xff] }
 0x1ce   :  { %3732 = vmatpush1.bf16.msra.mxu0 %v4951_v11  ;;  %3896 = vmatpush1.bf16.msra.mxu1 %v4953_v54  ;;  %v534_v11 = vld [vmem:[#allocation6 + $0xa30] sm:$0xff]  ;;  %v531_v54 = vld [vmem:[#allocation6 + $0xa18] sm:$0xff] }
 0x1cf   :  { %3733 = vmatprep.subr.bf16.mxu0 %v4960_v12  ;;  %3897 = vmatprep.subr.bf16.mxu1 %v4962_v13  ;;  %v535_v12 = vld [vmem:[#allocation6 + $0xa38] sm:$0xff]  ;;  %v5007_v13 = vcombine.low %v522_v43, %v526_v62  ;;  %v5016_v16 = vcombine.high %v530_v10, %v534_v11 }
 0x1d0   :  { %3763 = vmatprep.mubr.bf16.mxu0 %v5717_v32  ;;  %3927 = vmatprep.mubr.bf16.mxu1 %v5717_v32  ;;  %v4986_v32 = vcombine.high %v499_v36, %v503_v28  ;;  %v5018_v17 = vcombine.high %v531_v54, %v535_v12  ;;  %v5017_v25 = vcombine.low %v531_v54, %v535_v12  ;;  %v554_v28 = vld [vmem:[#allocation6 + $0xad0] sm:$0xff] }
 0x1d1   :  { %v586_v12 = vld [vmem:[#allocation6 + $0xbd0] sm:$0xff] }
 0x1d2   :  { %3734 = vmatpush1.bf16.msra.mxu0 %v4959_v46  ;;  %3898 = vmatpush1.bf16.msra.mxu1 %v4961_v21  ;;  %v542_v46 = vld [vmem:[#allocation6 + $0xa70] sm:$0xff]  ;;  %v539_v21 = vld [vmem:[#allocation6 + $0xa58] sm:$0xff] }
 0x1d3   :  { %3735 = vmatprep.subr.bf16.mxu0 %v4968_v23  ;;  %3899 = vmatprep.subr.bf16.mxu1 %v4970_v24  ;;  %v543_v23 = vld [vmem:[#allocation6 + $0xa78] sm:$0xff]  ;;  %v5015_v24 = vcombine.low %v530_v10, %v534_v11  ;;  %v5024_v26 = vcombine.high %v538_v18, %v542_v46 }
 0x1d4   :  { %v5026_v27 = vcombine.high %v539_v21, %v543_v23  ;;  %v5025_v34 = vcombine.low %v539_v21, %v543_v23  ;;  %v594_v23 = vld [vmem:[#allocation6 + $0xc10] sm:$0xff] }
 0x1d6   :  { %3736 = vmatpush1.bf16.msra.mxu0 %v4967_v30  ;;  %3900 = vmatpush1.bf16.msra.mxu1 %v4969_v20  ;;  %v550_v30 = vld [vmem:[#allocation6 + $0xab0] sm:$0xff]  ;;  %v547_v20 = vld [vmem:[#allocation6 + $0xa98] sm:$0xff] }
 0x1d7   :  { %3737 = vmatprep.subr.bf16.mxu0 %v4976_v31  ;;  %3901 = vmatprep.subr.bf16.mxu1 %v4978_v0  ;;  %v551_v31 = vld [vmem:[#allocation6 + $0xab8] sm:$0xff]  ;;  %v5023_v0 = vcombine.low %v538_v18, %v542_v46  ;;  %v5032_v35 = vcombine.high %v546_v29, %v550_v30 }
 0x1d8   :  { %v5034_v36 = vcombine.high %v547_v20, %v551_v31  ;;  %v5033_v40 = vcombine.low %v547_v20, %v551_v31  ;;  %v602_v31 = vld [vmem:[#allocation6 + $0xc50] sm:$0xff] }
 0x1da   :  { %3738 = vmatpush1.bf16.msra.mxu0 %v4975_v37  ;;  %3902 = vmatpush1.bf16.msra.mxu1 %v4977_v38  ;;  %v558_v37 = vld [vmem:[#allocation6 + $0xaf0] sm:$0xff]  ;;  %v555_v38 = vld [vmem:[#allocation6 + $0xad8] sm:$0xff] }
 0x1db   :  { %3739 = vmatprep.subr.bf16.mxu0 %v4984_v39  ;;  %3903 = vmatprep.subr.bf16.mxu1 %v4986_v32  ;;  %v559_v39 = vld [vmem:[#allocation6 + $0xaf8] sm:$0xff]  ;;  %v5031_v32 = vcombine.low %v546_v29, %v550_v30  ;;  %v5040_v41 = vcombine.high %v554_v28, %v558_v37 }
 0x1dc   :  { %v5042_v42 = vcombine.high %v555_v38, %v559_v39  ;;  %v5041_v49 = vcombine.low %v555_v38, %v559_v39  ;;  %v610_v39 = vld [vmem:[#allocation6 + $0xc90] sm:$0xff] }
 0x1de   :  { %3740 = vmatpush1.bf16.msra.mxu0 %v4983_v4  ;;  %3904 = vmatpush1.bf16.msra.mxu1 %v4985_v45  ;;  %v566_v4 = vld [vmem:[#allocation6 + $0xb30] sm:$0xff]  ;;  %v563_v45 = vld [vmem:[#allocation6 + $0xb18] sm:$0xff] }
 0x1df   :  { %3741 = vmatprep.subr.bf16.mxu0 %v4992_v47  ;;  %3905 = vmatprep.subr.bf16.mxu1 %v4994_v48  ;;  %v567_v47 = vld [vmem:[#allocation6 + $0xb38] sm:$0xff]  ;;  %v5039_v48 = vcombine.low %v554_v28, %v558_v37  ;;  %v5048_v50 = vcombine.high %v562_v44, %v566_v4 }
 0x1e0   :  { %v5050_v52 = vcombine.high %v563_v45, %v567_v47  ;;  %v5049_v43 = vcombine.low %v563_v45, %v567_v47  ;;  %v618_v47 = vld [vmem:[#allocation6 + $0xcd0] sm:$0xff] }
 0x1e2   :  { %3742 = vmatpush1.bf16.msra.mxu0 %v4991_v55  ;;  %3906 = vmatpush1.bf16.msra.mxu1 %v4993_v56  ;;  %v574_v55 = vld [vmem:[#allocation6 + $0xb70] sm:$0xff]  ;;  %v571_v56 = vld [vmem:[#allocation6 + $0xb58] sm:$0xff] }
 0x1e3   :  { %3743 = vmatprep.subr.bf16.mxu0 %v5000_v57  ;;  %3907 = vmatprep.subr.bf16.mxu1 %v5002_v60  ;;  %v575_v57 = vld [vmem:[#allocation6 + $0xb78] sm:$0xff]  ;;  %v5047_v60 = vcombine.low %v562_v44, %v566_v4  ;;  %v5056_v62 = vcombine.high %v570_v53, %v574_v55 }
 0x1e4   :  { %v5058_v63 = vcombine.high %v571_v56, %v575_v57  ;;  %v5057_v10 = vcombine.low %v571_v56, %v575_v57  ;;  %v626_v56 = vld [vmem:[#allocation6 + $0xd10] sm:$0xff] }
 0x1e5   :  { %v630_v57 = vld [vmem:[#allocation6 + $0xd30] sm:$0xff] }
 0x1e6   :  { %3744 = vmatpush1.bf16.msra.mxu0 %v4999_v2  ;;  %3908 = vmatpush1.bf16.msra.mxu1 %v5001_v5  ;;  %v582_v2 = vld [vmem:[#allocation6 + $0xbb0] sm:$0xff]  ;;  %v579_v5 = vld [vmem:[#allocation6 + $0xb98] sm:$0xff] }
 0x1e7   :  { %3745 = vmatprep.subr.bf16.mxu0 %v5008_v6  ;;  %3909 = vmatprep.subr.bf16.mxu1 %v5010_v8  ;;  %v583_v6 = vld [vmem:[#allocation6 + $0xbb8] sm:$0xff]  ;;  %v5055_v8 = vcombine.low %v570_v53, %v574_v55  ;;  %v5064_v11 = vcombine.high %v578_v1, %v582_v2 }
 0x1e8   :  { %v5066_v54 = vcombine.high %v579_v5, %v583_v6  ;;  %v5065_v18 = vcombine.low %v579_v5, %v583_v6  ;;  %v638_v5 = vld [vmem:[#allocation6 + $0xd70] sm:$0xff]  ;;  %v635_v6 = vld [vmem:[#allocation6 + $0xd58] sm:$0xff] }
 0x1ea   :  { %3746 = vmatpush1.bf16.msra.mxu0 %v5007_v13  ;;  %3910 = vmatpush1.bf16.msra.mxu1 %v5009_v15  ;;  %v590_v13 = vld [vmem:[#allocation6 + $0xbf0] sm:$0xff]  ;;  %v587_v15 = vld [vmem:[#allocation6 + $0xbd8] sm:$0xff] }
 0x1eb   :  { %3747 = vmatprep.subr.bf16.mxu0 %v5016_v16  ;;  %3911 = vmatprep.subr.bf16.mxu1 %v5018_v17  ;;  %v591_v16 = vld [vmem:[#allocation6 + $0xbf8] sm:$0xff]  ;;  %v5063_v17 = vcombine.low %v578_v1, %v582_v2  ;;  %v5072_v46 = vcombine.high %v586_v12, %v590_v13  ;;  %v5112_v1 = vcombine.high %v626_v56, %v630_v57  ;;  %v634_v2 = vld [vmem:[#allocation6 + $0xd50] sm:$0xff] }
 0x1ec   :  { %v5074_v21 = vcombine.high %v587_v15, %v591_v16  ;;  %v5073_v29 = vcombine.low %v587_v15, %v591_v16  ;;  %v646_v15 = vld [vmem:[#allocation6 + $0xdb0] sm:$0xff]  ;;  %v643_v16 = vld [vmem:[#allocation6 + $0xd98] sm:$0xff] }
 0x1ee   :  { %3748 = vmatpush1.bf16.msra.mxu0 %v5015_v24  ;;  %3912 = vmatpush1.bf16.msra.mxu1 %v5017_v25  ;;  %v598_v24 = vld [vmem:[#allocation6 + $0xc30] sm:$0xff]  ;;  %v595_v25 = vld [vmem:[#allocation6 + $0xc18] sm:$0xff] }
 0x1ef   :  { %3749 = vmatprep.subr.bf16.mxu0 %v5024_v26  ;;  %3913 = vmatprep.subr.bf16.mxu1 %v5026_v27  ;;  %v599_v26 = vld [vmem:[#allocation6 + $0xc38] sm:$0xff]  ;;  %v5071_v27 = vcombine.low %v586_v12, %v590_v13  ;;  %v5080_v30 = vcombine.high %v594_v23, %v598_v24  ;;  %v642_v13 = vld [vmem:[#allocation6 + $0xd90] sm:$0xff] }
 0x1f0   :  { %v5082_v20 = vcombine.high %v595_v25, %v599_v26  ;;  %v5081_v28 = vcombine.low %v595_v25, %v599_v26  ;;  %v650_v25 = vld [vmem:[#allocation6 + $0xdd0] sm:$0xff] }
 0x1f1   :  { %v654_v26 = vld [vmem:[#allocation6 + $0xdf0] sm:$0xff] }
 0x1f2   :  { %3750 = vmatpush1.bf16.msra.mxu0 %v5023_v0  ;;  %3914 = vmatpush1.bf16.msra.mxu1 %v5025_v34  ;;  %v606_v0 = vld [vmem:[#allocation6 + $0xc70] sm:$0xff]  ;;  %v603_v34 = vld [vmem:[#allocation6 + $0xc58] sm:$0xff] }
 0x1f3   :  { %3751 = vmatprep.subr.bf16.mxu0 %v5032_v35  ;;  %3915 = vmatprep.subr.bf16.mxu1 %v5034_v36  ;;  %v607_v35 = vld [vmem:[#allocation6 + $0xc78] sm:$0xff]  ;;  %v5079_v36 = vcombine.low %v594_v23, %v598_v24  ;;  %v5088_v37 = vcombine.high %v602_v31, %v606_v0 }
 0x1f4   :  { %v5090_v38 = vcombine.high %v603_v34, %v607_v35  ;;  %v5089_v44 = vcombine.low %v603_v34, %v607_v35  ;;  %v5127_v34 = vcombine.low %v642_v13, %v646_v15 }
 0x1f6   :  { %3752 = vmatpush1.bf16.msra.mxu0 %v5031_v32  ;;  %3916 = vmatpush1.bf16.msra.mxu1 %v5033_v40  ;;  %v614_v32 = vld [vmem:[#allocation6 + $0xcb0] sm:$0xff]  ;;  %v611_v40 = vld [vmem:[#allocation6 + $0xc98] sm:$0xff] }
 0x1f7   :  { %3753 = vmatprep.subr.bf16.mxu0 %v5040_v41  ;;  %3917 = vmatprep.subr.bf16.mxu1 %v5042_v42  ;;  %v615_v41 = vld [vmem:[#allocation6 + $0xcb8] sm:$0xff]  ;;  %v5087_v42 = vcombine.low %v602_v31, %v606_v0  ;;  %v5096_v4 = vcombine.high %v610_v39, %v614_v32 }
 0x1f8   :  { %v5098_v45 = vcombine.high %v611_v40, %v615_v41 }
 0x1fa   :  { %3754 = vmatpush1.bf16.msra.mxu0 %v5039_v48  ;;  %3918 = vmatpush1.bf16.msra.mxu1 %v5041_v49  ;;  %v622_v48 = vld [vmem:[#allocation6 + $0xcf0] sm:$0xff]  ;;  %v619_v49 = vld [vmem:[#allocation6 + $0xcd8] sm:$0xff] }
 0x1fb   :  { %3755 = vmatprep.subr.bf16.mxu0 %v5048_v50  ;;  %3919 = vmatprep.subr.bf16.mxu1 %v5050_v52  ;;  %v623_v50 = vld [vmem:[#allocation6 + $0xcf8] sm:$0xff]  ;;  %v5095_v52 = vcombine.low %v610_v39, %v614_v32  ;;  %v5104_v53 = vcombine.high %v618_v47, %v622_v48  ;;  %v658_v32 = vld [vmem:[#allocation6 + $0xe10] sm:$0xff] }
 0x1fc   :  { %v5106_v55 = vcombine.high %v619_v49, %v623_v50 }
 0x1fe   :  { %3756 = vmatpush1.bf16.msra.mxu0 %v5047_v60  ;;  %3920 = vmatpush1.bf16.msra.mxu1 %v5049_v43  ;;  %v627_v60 = vld [vmem:[#allocation6 + $0xd18] sm:$0xff] }
 0x1ff   :  { %3757 = vmatprep.subr.bf16.mxu0 %v5056_v62  ;;  %3921 = vmatprep.subr.bf16.mxu1 %v5058_v63  ;;  %v631_v43 = vld [vmem:[#allocation6 + $0xd38] sm:$0xff]  ;;  %v5103_v62 = vcombine.low %v618_v47, %v622_v48  ;;  %v5105_v63 = vcombine.low %v619_v49, %v623_v50  ;;  %v666_v48 = vld [vmem:[#allocation6 + $0xe50] sm:$0xff] }
 0x200   :  { %v670_v49 = vld [vmem:[#allocation6 + $0xe70] sm:$0xff]  ;;  %v667_v50 = vld [vmem:[#allocation6 + $0xe58] sm:$0xff] }
 0x202   :  { %3758 = vmatpush1.bf16.msra.mxu0 %v5055_v8  ;;  %3922 = vmatpush1.bf16.msra.mxu1 %v5057_v10  ;;  %v639_v8 = vld [vmem:[#allocation6 + $0xd78] sm:$0xff]  ;;  %v5111_v10 = vcombine.low %v626_v56, %v630_v57  ;;  %v674_v57 = vld [vmem:[#allocation6 + $0xe90] sm:$0xff] }
 0x203   :  { %3759 = vmatprep.subr.bf16.mxu0 %v5064_v11  ;;  %3923 = vmatprep.subr.bf16.mxu1 %v5066_v54  ;;  %v5113_v11 = vcombine.low %v627_v60, %v631_v43  ;;  %v5120_v54 = vcombine.high %v634_v2, %v638_v5  ;;  %v5122_v12 = vcombine.high %v635_v6, %v639_v8 }
 0x206   :  { %3760 = vmatpush1.bf16.msra.mxu0 %v5063_v17  ;;  %3924 = vmatpush1.bf16.msra.mxu1 %v5065_v18  ;;  %v647_v17 = vld [vmem:[#allocation6 + $0xdb8] sm:$0xff]  ;;  %v5119_v18 = vcombine.low %v634_v2, %v638_v5  ;;  %v682_v5 = vld [vmem:[#allocation6 + $0xed0] sm:$0xff] }
 0x207   :  { %3761 = vmatprep.subr.bf16.mxu0 %v5072_v46  ;;  %3925 = vmatprep.subr.bf16.mxu1 %v5074_v21  ;;  %v5121_v46 = vcombine.low %v635_v6, %v639_v8  ;;  %v5128_v21 = vcombine.high %v642_v13, %v646_v15  ;;  %v5130_v24 = vcombine.high %v643_v16, %v647_v17  ;;  %v686_v6 = vld [vmem:[#allocation6 + $0xef0] sm:$0xff]  ;;  %v683_v8 = vld [vmem:[#allocation6 + $0xed8] sm:$0xff] }
 0x208   :  { %v690_v15 = vld [vmem:[#allocation6 + $0xf10] sm:$0xff] }
 0x20a   :  { %3762 = vmatpush1.bf16.msra.mxu0 %v5071_v27  ;;  %3926 = vmatpush1.bf16.msra.mxu1 %v5073_v29 }
 0x20b   :  { %3772 = vmatprep.subr.bf16.mxu0 %v5080_v30  ;;  %3936 = vmatprep.subr.bf16.mxu1 %v5082_v20  ;;  %v651_v30 = vld [vmem:[#allocation6 + $0xdd8] sm:$0xff] }
 0x20c   :  { %v655_v20 = vld [vmem:[#allocation6 + $0xdf8] sm:$0xff] }
 0x20d   :  { %3764 = vmatmul.mubr.bf16.vlgmr.msra.gmra.mrb[4].mxu0 %v5737_v9  ;;  %3928 = vmatmul.mubr.bf16.vlgmr.msra.gmra.mrb[4].mxu1 %v5737_v9  ;;  %v5097_v9 = vcombine.low %v611_v40, %v615_v41  ;;  %v5138_v39 = vcombine.high %v651_v30, %v655_v20  ;;  %v662_v40 = vld [vmem:[#allocation6 + $0xe30] sm:$0xff]  ;;  %v659_v41 = vld [vmem:[#allocation6 + $0xe18] sm:$0xff] }
 0x20e   :  { %3773 = vmatpush1.bf16.msra.mxu0 %v5079_v36  ;;  %3937 = vmatpush1.bf16.msra.mxu1 %v5081_v28  ;;  %v5129_v28 = vcombine.low %v643_v16, %v647_v17  ;;  %v694_v16 = vld [vmem:[#allocation6 + $0xf30] sm:$0xff]  ;;  %v691_v17 = vld [vmem:[#allocation6 + $0xf18] sm:$0xff] }
 0x20f   :  { %3774 = vmatprep.subr.bf16.mxu0 %v5088_v37  ;;  %3938 = vmatprep.subr.bf16.mxu1 %v5090_v38  ;;  %v5136_v37 = vcombine.high %v650_v25, %v654_v26 }
 0x210   :  { %3804 = vmatprep.mubr.bf16.mxu0 %v5739_v19  ;;  %3968 = vmatprep.mubr.bf16.mxu1 %v5739_v19  ;;  %v5114_v19 = vcombine.high %v627_v60, %v631_v43  ;;  %v678_v60 = vld [vmem:[#allocation6 + $0xeb0] sm:$0xff]  ;;  %v675_v43 = vld [vmem:[#allocation6 + $0xe98] sm:$0xff] }
 0x212   :  { %3775 = vmatpush1.bf16.msra.mxu0 %v5087_v42  ;;  %3939 = vmatpush1.bf16.msra.mxu1 %v5089_v44  ;;  %v663_v42 = vld [vmem:[#allocation6 + $0xe38] sm:$0xff]  ;;  %v5135_v44 = vcombine.low %v650_v25, %v654_v26  ;;  %v698_v26 = vld [vmem:[#allocation6 + $0xf50] sm:$0xff] }
 0x213   :  { %3776 = vmatprep.subr.bf16.mxu0 %v5096_v4  ;;  %3940 = vmatprep.subr.bf16.mxu1 %v5098_v45  ;;  %v5137_v4 = vcombine.low %v651_v30, %v655_v20  ;;  %v5144_v45 = vcombine.high %v658_v32, %v662_v40  ;;  %v5146_v47 = vcombine.high %v659_v41, %v663_v42  ;;  %v702_v30 = vld [vmem:[#allocation6 + $0xf70] sm:$0xff]  ;;  %v699_v20 = vld [vmem:[#allocation6 + $0xf58] sm:$0xff] }
 0x216   :  { %3777 = vmatpush1.bf16.msra.mxu0 %v5095_v52  ;;  %3941 = vmatpush1.bf16.msra.mxu1 %v5097_v9  ;;  %v671_v52 = vld [vmem:[#allocation6 + $0xe78] sm:$0xff]  ;;  %v5143_v9 = vcombine.low %v658_v32, %v662_v40  ;;  %v710_v32 = vld [vmem:[#allocation6 + $0xfb0] sm:$0xff] }
 0x217   :  { %3778 = vmatprep.subr.bf16.mxu0 %v5104_v53  ;;  %3942 = vmatprep.subr.bf16.mxu1 %v5106_v55  ;;  %v5145_v53 = vcombine.low %v659_v41, %v663_v42  ;;  %v5152_v55 = vcombine.high %v666_v48, %v670_v49  ;;  %v5154_v56 = vcombine.high %v667_v50, %v671_v52  ;;  %v707_v41 = vld [vmem:[#allocation6 + $0xf98] sm:$0xff] }
 0x218   :  { %v711_v42 = vld [vmem:[#allocation6 + $0xfb8] sm:$0xff] }
 0x21a   :  { %3779 = vmatpush1.bf16.msra.mxu0 %v5103_v62  ;;  %3943 = vmatpush1.bf16.msra.mxu1 %v5105_v63  ;;  %v679_v62 = vld [vmem:[#allocation6 + $0xeb8] sm:$0xff]  ;;  %v5151_v63 = vcombine.low %v666_v48, %v670_v49  ;;  %v714_v48 = vld [vmem:[#allocation6 + $0xfd0] sm:$0xff] }
 0x21b   :  { %3780 = vmatprep.subr.bf16.mxu0 %v5112_v1  ;;  %3944 = vmatprep.subr.bf16.mxu1 %v5114_v19  ;;  %v5153_v1 = vcombine.low %v667_v50, %v671_v52  ;;  %v5160_v19 = vcombine.high %v674_v57, %v678_v60  ;;  %v5162_v2 = vcombine.high %v675_v43, %v679_v62  ;;  %v718_v49 = vld [vmem:[#allocation6 + $0xff0] sm:$0xff]  ;;  %v715_v52 = vld [vmem:[#allocation6 + $0xfd8] sm:$0xff] }
 0x21e   :  { %3781 = vmatpush1.bf16.msra.mxu0 %v5111_v10  ;;  %3945 = vmatpush1.bf16.msra.mxu1 %v5113_v11  ;;  %v687_v10 = vld [vmem:[#allocation6 + $0xef8] sm:$0xff]  ;;  %v5159_v11 = vcombine.low %v674_v57, %v678_v60  ;;  %v5200_v57 = vcombine.high %v714_v48, %v718_v49 }
 0x21f   :  { %3782 = vmatprep.subr.bf16.mxu0 %v5120_v54  ;;  %3946 = vmatprep.subr.bf16.mxu1 %v5122_v12  ;;  %v5161_v54 = vcombine.low %v675_v43, %v679_v62  ;;  %v5168_v12 = vcombine.high %v682_v5, %v686_v6  ;;  %v5170_v13 = vcombine.high %v683_v8, %v687_v10 }
 0x220   :  { %v5770_v23 = vpop.f32.mrb[0].mxu0  ;;  %v5772_v27 = vpop.f32.mrb[0].mxu1 }
 0x221   :  { %v5774_v29 = vpop.f32.mrb[1].mxu0  ;;  %v5776_v31 = vpop.f32.mrb[1].mxu1 }
 0x222   :  { %v3482_v0 = vpop.f32.mrb[2].mxu0  ;;  %3783 = vmatpush1.bf16.msra.mxu0 %v5119_v18  ;;  %v3646_v35 = vpop.f32.mrb[2].mxu1  ;;  %3947 = vmatpush1.bf16.msra.mxu1 %v5121_v46  ;;  %v695_v18 = vld [vmem:[#allocation6 + $0xf38] sm:$0xff]  ;;  %v5167_v46 = vcombine.low %v682_v5, %v686_v6  ;;  %v5421_v5 = vld [vmem:[#allocation7] sm:$0xff]  }
 0x223   :  { %v3483_v36 = vpop.f32.mrb[3].mxu0  ;;  %3784 = vmatprep.subr.bf16.mxu0 %v5128_v21  ;;  %v3647_v38 = vpop.f32.mrb[3].mxu1  ;;  %3948 = vmatprep.subr.bf16.mxu1 %v5130_v24  ;;  %v5169_v21 = vcombine.low %v683_v8, %v687_v10  ;;  %v5176_v24 = vcombine.high %v690_v15, %v694_v16  ;;  %v5178_v25 = vcombine.high %v691_v17, %v695_v18  ;;  %v703_v0 = vld [vmem:[#allocation6 + $0xf78] sm:$0xff]  ;;  %v5422_v6 = vld [vmem:[#allocation7 + $0x80] sm:$0xff]   ;;  %v5423_v8 = vld [vmem:[#allocation7 + $0x48] sm:$0xff]  }
 0x224   :  { %v86_v35 = vld [vmem:[#allocation4 + $0x2] ss:$8 sm:$0xf0]  ;;  %v5175_v36 = vcombine.low %v690_v15, %v694_v16  ;;  %v5186_v38 = vcombine.high %v699_v20, %v703_v0 }
 0x225   :  { %v5429_v15 = vld [vmem:[#allocation7 + $0x10] sm:$0xff]  }
 0x226   :  { %3785 = vmatpush1.bf16.msra.mxu0 %v5127_v34  ;;  %3949 = vmatpush1.bf16.msra.mxu1 %v5129_v28  ;;  %v85_v34 = vld [vmem:[#allocation4 + $0x2] ss:$8 sm:$0xf]  ;;  %v5177_v28 = vcombine.low %v691_v17, %v695_v18 }
 0x227   :  { %3786 = vmatprep.subr.bf16.mxu0 %v5136_v37  ;;  %3950 = vmatprep.subr.bf16.mxu1 %v5138_v39  ;;  %v5184_v37 = vcombine.high %v698_v26, %v702_v30  ;;  %v706_v39 = vld [vmem:[#allocation6 + $0xf90] sm:$0xff]  ;;  %v5778_v40 = vor.u32 %v86_v35, %v85_v34  ;;  %v5431_v17 = vld [vmem:[#allocation7 + $0x58] sm:$0xff]   ;;  %v5442_v35 = vld [vmem:[#allocation7 + $0xa8] sm:$0xff]  }
 0x228   :  { %v5430_v16 = vld [vmem:[#allocation7 + $0x90] sm:$0xff]   ;;  %v5432_v18 = vld [vmem:[#allocation7 + $0xd8] sm:$0xff]  }
 0x229   :  { %v728_v50 = vrot.slane %v5778_v40, %v5665_v58  ;;  %v724_v34 = vrot.slane %v5778_v40, %v5680_v51 }
 0x22a   :  { %3787 = vmatpush1.bf16.msra.mxu0 %v5135_v44  ;;  %3951 = vmatpush1.bf16.msra.mxu1 %v5137_v4  ;;  %v5183_v44 = vcombine.low %v698_v26, %v702_v30  ;;  %v5185_v4 = vcombine.low %v699_v20, %v703_v0  ;;  %v5438_v26 = vld [vmem:[#allocation7 + $0xa0] sm:$0xff]   ;;  %v5439_v30 = vld [vmem:[#allocation7 + $0x68] sm:$0xff]  }
 0x22b   :  { %3788 = vmatprep.subr.bf16.mxu0 %v5144_v45  ;;  %3952 = vmatprep.subr.bf16.mxu1 %v5146_v47  ;;  %v5192_v45 = vcombine.high %v706_v39, %v710_v32  ;;  %v5194_v47 = vcombine.high %v707_v41, %v711_v42  ;;  %v5356_v43 = vadd.f32 %v5774_v29, %v728_v50  ;;  %v5440_v20 = vld [vmem:[#allocation7 + $0xe8] sm:$0xff]  }
 0x22c   :  { %v5441_v0 = vld [vmem:[#allocation7 + $0x28] sm:$0xff]  }
 0x22e   :  { %3789 = vmatpush1.bf16.msra.mxu0 %v5143_v9  ;;  %3953 = vmatpush1.bf16.msra.mxu1 %v5145_v53  ;;  %v719_v9 = vld [vmem:[#allocation6 + $0xff8] sm:$0xff]  ;;  %v736_v53 = vrot.slane %v5778_v40, %v5683_v59  ;;  %v5420_v59 = vld [vmem:[#allocation7 + $0xc0] sm:$0xff]  }
 0x22f   :  { %3790 = vmatprep.subr.bf16.mxu0 %v5152_v55  ;;  %3954 = vmatprep.subr.bf16.mxu1 %v5154_v56  ;;  %v5191_v55 = vcombine.low %v706_v39, %v710_v32  ;;  %v5193_v56 = vcombine.low %v707_v41, %v711_v42  ;;  %v5202_v60 = vcombine.high %v715_v52, %v719_v9  ;;  %v5446_v32 = vld [vmem:[#allocation7 + $0xb0] sm:$0xff]   ;;  %v5447_v41 = vld [vmem:[#allocation7 + $0x78] sm:$0xff]  }
 0x230   :  { %v5358_v62 = vadd.f32 %v5776_v31, %v736_v53  ;;  %v5201_v58 = vcombine.low %v715_v52, %v719_v9  ;;  %v5424_v31 = vld [vmem:[#allocation7 + $0xc8] sm:$0xff]   ;;  %v5355_v39 = vadd.f32 %v5770_v23, %v724_v34  ;;  %v5453_v23 = vld [vmem:[#allocation7 + $0x100] sm:$0xff]  }
 0x231   :  { %v5454_v52 = vld [vmem:[#allocation7 + $0x180] sm:$0xff]   ;;  %v5455_v9 = vld [vmem:[#allocation7 + $0x148] sm:$0xff]  }
 0x232   :  { %3791 = vmatpush1.bf16.msra.mxu0 %v5151_v63  ;;  %3955 = vmatpush1.bf16.msra.mxu1 %v5153_v1  ;;  %v5199_v63 = vcombine.low %v714_v48, %v718_v49  ;;  %v5419_v1 = vld [vmem:[#allocation7 + $0x40] sm:$0xff]   ;;  %v5456_v53 = vld [vmem:[#allocation7 + $0x1c8] sm:$0xff]  }
 0x233   :  { %3792 = vmatprep.subr.bf16.mxu0 %v5160_v19  ;;  %3956 = vmatprep.subr.bf16.mxu1 %v5162_v2  ;;  %v3978_v19 = vmax.f32 %v5356_v43, 0.0  ;;  %v3980_v2 = vmax.f32 %v5358_v62, 0.0  ;;  %v5452_v49 = vld [vmem:[#allocation7 + $0x1c0] sm:$0xff]   ;;  %v5461_v43 = vld [vmem:[#allocation7 + $0x110] sm:$0xff]  }
 0x234   :  { %v5462_v62 = vld [vmem:[#allocation7 + $0x190] sm:$0xff]  }
 0x235   :  { %v3986_v29 = vpack.c.bf16 %v3978_v19, %v3978_v19  ;;  %v3988_v10 = vpack.c.bf16 %v3980_v2, %v3980_v2  ;;  %v5467_v19 = vld [vmem:[#allocation7 + $0x160] sm:$0xff]  }
 0x236   :  { %3793 = vmatpush1.bf16.msra.mxu0 %v5159_v11  ;;  %3957 = vmatpush1.bf16.msra.mxu1 %v5161_v54  ;;  %v5425_v11 = vld [vmem:[#allocation7 + $0x8] sm:$0xff]   ;;  %v5468_v2 = vld [vmem:[#allocation7 + $0x1e0] sm:$0xff]  }
 0x237   :  { %3794 = vmatprep.subr.bf16.mxu0 %v5168_v12  ;;  %3958 = vmatprep.subr.bf16.mxu1 %v5170_v13  ;;  %v5426_v54 = vld [vmem:[#allocation7 + $0x88] sm:$0xff]   ;;  %v5427_v12 = vld [vmem:[#allocation7 + $0x50] sm:$0xff]  }
 0x238   :  { %v5428_v13 = vld [vmem:[#allocation7 + $0xd0] sm:$0xff]  }
 0x23a   :  { %3795 = vmatpush1.bf16.msra.mxu0 %v5167_v46  ;;  %3959 = vmatpush1.bf16.msra.mxu1 %v5169_v21  ;;  %v5434_v46 = vld [vmem:[#allocation7 + $0x98] sm:$0xff]   ;;  %v5435_v21 = vld [vmem:[#allocation7 + $0x60] sm:$0xff]  }
 0x23b   :  { %3796 = vmatprep.subr.bf16.mxu0 %v5176_v24  ;;  %3960 = vmatprep.subr.bf16.mxu1 %v5178_v25  ;;  %v5436_v24 = vld [vmem:[#allocation7 + $0xe0] sm:$0xff]  }
 0x23c   :  { %v5437_v25 = vld [vmem:[#allocation7 + $0x20] sm:$0xff]  }
 0x23e   :  { %3797 = vmatpush1.bf16.msra.mxu0 %v5175_v36  ;;  %3961 = vmatpush1.bf16.msra.mxu1 %v5177_v28  ;;  %v5443_v36 = vld [vmem:[#allocation7 + $0x70] sm:$0xff]   ;;  %v732_v28 = vrot.slane %v5778_v40, %v5702_v22  ;;  %v5450_v22 = vld [vmem:[#allocation7 + $0xb8] sm:$0xff]  }
 0x23f   :  { %3798 = vmatprep.subr.bf16.mxu0 %v5184_v37  ;;  %3962 = vmatprep.subr.bf16.mxu1 %v5186_v38  ;;  %v5444_v37 = vld [vmem:[#allocation7 + $0xf0] sm:$0xff]  }
 0x240   :  { %v5445_v38 = vld [vmem:[#allocation7 + $0x30] sm:$0xff]   ;;  %v5357_v42 = vadd.f32 %v5772_v27, %v732_v28 }
 0x242   :  { %3799 = vmatpush1.bf16.msra.mxu0 %v5183_v44  ;;  %3963 = vmatpush1.bf16.msra.mxu1 %v5185_v4  ;;  %v5448_v44 = vld [vmem:[#allocation7 + $0xf8] sm:$0xff]   ;;  %v3979_v48 = vmax.f32 %v5357_v42, 0.0 }
 0x243   :  { %3800 = vmatprep.subr.bf16.mxu0 %v5192_v45  ;;  %3964 = vmatprep.subr.bf16.mxu1 %v5194_v47  ;;  %v5449_v4 = vld [vmem:[#allocation7 + $0x38] sm:$0xff]   ;;  %v3977_v45 = vmax.f32 %v5355_v39, 0.0  ;;  %v5451_v47 = vld [vmem:[#allocation7 + $0x140] sm:$0xff]  }
 0x244   :  { %v3987_v27 = vpack.c.bf16 %v3979_v48, %v3979_v48 }
 0x245   :  { %v3985_v50 = vpack.c.bf16 %v3977_v45, %v3977_v45  ;;  %v88_v45 = vld [vmem:[#allocation4 + $0x3] ss:$0 sm:$0xff] }
 0x246   :  { %3801 = vmatpush1.bf16.msra.mxu0 %v5191_v55  ;;  %3965 = vmatpush1.bf16.msra.mxu1 %v5193_v56  ;;  %v5457_v55 = vld [vmem:[#allocation7 + $0x108] sm:$0xff]  }
 0x247   :  { %3802 = vmatprep.subr.bf16.mxu0 %v5200_v57  ;;  %3966 = vmatprep.subr.bf16.mxu1 %v5202_v60  ;;  %v5458_v56 = vld [vmem:[#allocation7 + $0x188] sm:$0xff]   ;;  %v5459_v57 = vld [vmem:[#allocation7 + $0x150] sm:$0xff]  }
 0x248   :  { %v5460_v60 = vld [vmem:[#allocation7 + $0x1d0] sm:$0xff]  }
 0x24a   :  { %3803 = vmatpush1.bf16.msra.mxu0 %v5199_v63  ;;  %3967 = vmatpush1.bf16.msra.mxu1 %v5201_v58  ;;  %v5463_v63 = vld [vmem:[#allocation7 + $0x158] sm:$0xff]  }
 0x24b   :  { %5267 = vmatprep.subr.bf16.mxu0 %v5419_v1  ;;  %5289 = vmatprep.subr.bf16.mxu1 %v5420_v59  ;;  %v5464_v58 = vld [vmem:[#allocation7 + $0x1d8] sm:$0xff]  }
 0x24c   :  { %v5465_v1 = vld [vmem:[#allocation7 + $0x118] sm:$0xff]  }
 0x24d   :  { %3805 = vmatmul.mubr.bf16.vlgmr.msra.gmra.mrb[4].mxu0 %v5752_v61  ;;  %3969 = vmatmul.mubr.bf16.vlgmr.msra.gmra.mrb[4].mxu1 %v5752_v61  ;;  %v5433_v61 = vld [vmem:[#allocation7 + $0x18] sm:$0xff]  }
 0x24e   :  { %5268 = vmatpush3.bf16.msra.mxu0 %v5421_v5  ;;  %4537 = vmatprep.mubr.bf16.mxu0 %v3986_v29  ;;  %v5466_v59 = vld [vmem:[#allocation7 + $0x198] sm:$0xff]   ;;  %v5469_v5 = vld [vmem:[#allocation7 + $0x120] sm:$0xff]   ;;  %v5472_v29 = vld [vmem:[#allocation7 + $0x1e8] sm:$0xff]  }
 0x24f   :  { %5290 = vmatpush3.bf16.msra.mxu1 %v5422_v6  ;;  %4577 = vmatprep.mubr.bf16.mxu1 %v3988_v10  ;;  %v5470_v6 = vld [vmem:[#allocation7 + $0x1a0] sm:$0xff]   ;;  %v5474_v10 = vld [vmem:[#allocation7 + $0x1a8] sm:$0xff]  }
 0x250   :  { %5269 = vmatprep.subr.bf16.mxu0 %v5423_v8  ;;  %5291 = vmatprep.subr.bf16.mxu1 %v5424_v31  ;;  %v5471_v8 = vld [vmem:[#allocation7 + $0x168] sm:$0xff]  }
 0x251   :  { %v5473_v31 = vld [vmem:[#allocation7 + $0x128] sm:$0xff]  }
 0x252   :  { %5270 = vmatpush3.bf16.msra.mxu0 %v5425_v11  ;;  %v5475_v11 = vld [vmem:[#allocation7 + $0x170] sm:$0xff]  }
 0x253   :  { %5292 = vmatpush3.bf16.msra.mxu1 %v5426_v54  ;;  %5271 = vmatprep.subr.bf16.mxu0 %v5427_v12  ;;  %v5476_v54 = vld [vmem:[#allocation7 + $0x1f0] sm:$0xff]  }
 0x254   :  { %5293 = vmatprep.subr.bf16.mxu1 %v5428_v13  ;;  %v5477_v12 = vld [vmem:[#allocation7 + $0x130] sm:$0xff]  }
 0x255   :  { %v5478_v13 = vld [vmem:[#allocation7 + $0x1b0] sm:$0xff]  }
 0x256   :  { %5272 = vmatpush3.bf16.msra.mxu0 %v5429_v15  ;;  %v5479_v15 = vld [vmem:[#allocation7 + $0x178] sm:$0xff]  }
 0x257   :  { %5294 = vmatpush3.bf16.msra.mxu1 %v5430_v16  ;;  %5273 = vmatprep.subr.bf16.mxu0 %v5431_v17  ;;  %v5480_v16 = vld [vmem:[#allocation7 + $0x1f8] sm:$0xff]  }
 0x258   :  { %5295 = vmatprep.subr.bf16.mxu1 %v5432_v18  ;;  %v5481_v17 = vld [vmem:[#allocation7 + $0x138] sm:$0xff]  }
 0x259   :  { %v5482_v18 = vld [vmem:[#allocation7 + $0x1b8] sm:$0xff]  }
 0x25a   :  { %5274 = vmatpush3.bf16.msra.mxu0 %v5433_v61  ;;  %v740_v61 = vrot.slane %v5778_v40, %v5724_v7 }
 0x25b   :  { %5296 = vmatpush3.bf16.msra.mxu1 %v5434_v46  ;;  %5275 = vmatprep.subr.bf16.mxu0 %v5435_v21  ;;  %v748_v46 = vrot.slane %v5778_v40, %v5746_v3  ;;  %v744_v21 = vrot.slane %v5778_v40, %v5705_v33 }
 0x25c   :  { %5297 = vmatprep.subr.bf16.mxu1 %v5436_v24  ;;  %v752_v24 = vrot.slane %v5778_v40, %v5727_v14 }
 0x25e   :  { %5276 = vmatpush3.bf16.msra.mxu0 %v5437_v25 }
 0x25f   :  { %5298 = vmatpush3.bf16.msra.mxu1 %v5438_v26  ;;  %5277 = vmatprep.subr.bf16.mxu0 %v5439_v30 }
 0x260   :  { %5299 = vmatprep.subr.bf16.mxu1 %v5440_v20 }
 0x262   :  { %5278 = vmatpush3.bf16.msra.mxu0 %v5441_v0 }
 0x263   :  { %5300 = vmatpush3.bf16.msra.mxu1 %v5442_v35  ;;  %5279 = vmatprep.subr.bf16.mxu0 %v5443_v36 }
 0x264   :  { %5301 = vmatprep.subr.bf16.mxu1 %v5444_v37 }
 0x266   :  { %5280 = vmatpush3.bf16.msra.mxu0 %v5445_v38 }
 0x267   :  { %5302 = vmatpush3.bf16.msra.mxu1 %v5446_v32  ;;  %5281 = vmatprep.subr.bf16.mxu0 %v5447_v41 }
 0x268   :  { %5303 = vmatprep.subr.bf16.mxu1 %v5448_v44 }
 0x26a   :  { %5282 = vmatpush3.bf16.msra.mxu0 %v5449_v4 }
 0x26b   :  { %5304 = vmatpush3.bf16.msra.mxu1 %v5450_v22  ;;  %5311 = vmatprep.subr.bf16.mxu0 %v5451_v47 }
 0x26c   :  { %5333 = vmatprep.subr.bf16.mxu1 %v5452_v49 }
 0x26d   :  { %4538 = vmatmul.mubr.bf16.vlgmr.msra.gmra.mrb[8].mxu0 %v3985_v50 }
 0x26e   :  { %4578 = vmatmul.mubr.bf16.vlgmr.msra.gmra.mrb[8].mxu1 %v3987_v27  ;;  %5312 = vmatpush3.bf16.msra.mxu0 %v5453_v23 }
 0x26f   :  { %5334 = vmatpush3.bf16.msra.mxu1 %v5454_v52  ;;  %5313 = vmatprep.subr.bf16.mxu0 %v5455_v9 }
 0x270   :  { %5335 = vmatprep.subr.bf16.mxu1 %v5456_v53 }
 0x272   :  { %5314 = vmatpush3.bf16.msra.mxu0 %v5457_v55 }
 0x273   :  { %5336 = vmatpush3.bf16.msra.mxu1 %v5458_v56  ;;  %5315 = vmatprep.subr.bf16.mxu0 %v5459_v57 }
 0x274   :  { %5337 = vmatprep.subr.bf16.mxu1 %v5460_v60 }
 0x276   :  { %5316 = vmatpush3.bf16.msra.mxu0 %v5461_v43 }
 0x277   :  { %5338 = vmatpush3.bf16.msra.mxu1 %v5462_v62  ;;  %5317 = vmatprep.subr.bf16.mxu0 %v5463_v63 }
 0x278   :  { %5339 = vmatprep.subr.bf16.mxu1 %v5464_v58 }
 0x27a   :  { %5318 = vmatpush3.bf16.msra.mxu0 %v5465_v1 }
 0x27b   :  { %5340 = vmatpush3.bf16.msra.mxu1 %v5466_v59  ;;  %5319 = vmatprep.subr.bf16.mxu0 %v5467_v19 }
 0x27c   :  { %5341 = vmatprep.subr.bf16.mxu1 %v5468_v2 }
 0x27e   :  { %5320 = vmatpush3.bf16.msra.mxu0 %v5469_v5  ;;  %v89_v5 = vld [vmem:[#allocation4 + $0x4] ss:$0 sm:$0xff] }
 0x27f   :  { %5342 = vmatpush3.bf16.msra.mxu1 %v5470_v6  ;;  %5321 = vmatprep.subr.bf16.mxu0 %v5471_v8 }
 0x280   :  { %5343 = vmatprep.subr.bf16.mxu1 %v5472_v29  ;;  %v91_v29 = vld [vmem:[#allocation4 + $0x5] ss:$8 sm:$0xf] }
 0x282   :  { %5322 = vmatpush3.bf16.msra.mxu0 %v5473_v31  ;;  %v92_v31 = vld [vmem:[#allocation4 + $0x5] ss:$8 sm:$0xf0] }
 0x283   :  { %5344 = vmatpush3.bf16.msra.mxu1 %v5474_v10  ;;  %5323 = vmatprep.subr.bf16.mxu0 %v5475_v11  ;;  %v93_v10 = vor.u32 %v92_v31, %v91_v29 }
 0x284   :  { %5345 = vmatprep.subr.bf16.mxu1 %v5476_v54 }
 0x285   :  { %v4673_v11 = vrot.slane %v93_v10, %v5680_v51 }
 0x286   :  { %5324 = vmatpush3.bf16.msra.mxu0 %v5477_v12 }
 0x287   :  { %5346 = vmatpush3.bf16.msra.mxu1 %v5478_v13  ;;  %5325 = vmatprep.subr.bf16.mxu0 %v5479_v15 }
 0x288   :  { %5347 = vmatprep.subr.bf16.mxu1 %v5480_v16 }
 0x28a   :  { %5326 = vmatpush3.bf16.msra.mxu0 %v5481_v17 }
 0x28b   :  { %5348 = vmatpush3.bf16.msra.mxu1 %v5482_v18 }
 0x320   :  { %v3806_v25 = vpop.f32.mrb[4].mxu0  ;;  %v3970_v30 = vpop.f32.mrb[4].mxu1 }
 0x321   :  { %v5359_v26 = vadd.f32 %v3806_v25, %v740_v61  ;;  %v3808_v20 = vpop.f32.mrb[5].mxu0  ;;  %v5361_v0 = vadd.f32 %v3970_v30, %v748_v46  ;;  %v3972_v35 = vpop.f32.mrb[5].mxu1 }
 0x322   :  { %v5360_v34 = vadd.f32 %v3808_v20, %v744_v21  ;;  %v3810_v36 = vpop.f32.mrb[6].mxu0  ;;  %v5362_v37 = vadd.f32 %v3972_v35, %v752_v24  ;;  %v3974_v7 = vpop.f32.mrb[6].mxu1 }
 0x323   :  { %v3981_v28 = vmax.f32 %v5359_v26, 0.0  ;;  %v3811_v38 = vpop.f32.mrb[7].mxu0  ;;  %v3983_v39 = vmax.f32 %v5361_v0, 0.0  ;;  %v3975_v32 = vpop.f32.mrb[7].mxu1 }
 0x324   :  { %v3982_v3 = vmax.f32 %v5360_v34, 0.0  ;;  %v3984_v41 = vmax.f32 %v5362_v37, 0.0 }
 0x325   :  { %v3989_v42 = vpack.c.bf16 %v3981_v28, %v3981_v28  ;;  %v3991_v14 = vpack.c.bf16 %v3983_v39, %v3983_v39 }
 0x326   :  { %v3990_v33 = vpack.c.bf16 %v3982_v3, %v3982_v3  ;;  %v3992_v44 = vpack.c.bf16 %v3984_v41, %v3984_v41 }
 0x328   :  { %4617 = vmatprep.mubr.bf16.mxu0 %v3990_v33  ;;  %4657 = vmatprep.mubr.bf16.mxu1 %v3992_v44 }
 0x329   :  { %4618 = vmatmul.mubr.bf16.vlgmr.msra.gmra.mrb[12].mxu0 %v3989_v42  ;;  %4658 = vmatmul.mubr.bf16.vlgmr.msra.gmra.mrb[12].mxu1 %v3991_v14 }
 0x340   :  { %v5283_v40 = vpop.f32.mrb[8].mxu0 }
 0x341   :  { %v5305_v4 = vpop.f32.mrb[8].mxu1  ;;  %v5284_v22 = vpop.f32.mrb[9].mxu0 }
 0x342   :  { %v5285_v47 = vadd.f32 %v5284_v22, %v5283_v40  ;;  %v5306_v48 = vpop.f32.mrb[9].mxu1  ;;  %v5286_v49 = vpop.f32.mrb[10].mxu0 }
 0x343   :  { %v5307_v23 = vadd.f32 %v5306_v48, %v5305_v4  ;;  %v5308_v50 = vpop.f32.mrb[10].mxu1  ;;  %v5287_v52 = vpop.f32.mrb[11].mxu0 }
 0x344   :  { %v4540_v9 = vadd.f32 %v5285_v47, %v88_v45  ;;  %v5309_v27 = vpop.f32.mrb[11].mxu1 }
 0x346   :  { %v4580_v53 = vadd.f32 %v5307_v23, %v4540_v9 }
 0x3fc   :  { %v5327_v55 = vpop.f32.mrb[12].mxu0  ;;  %v5349_v56 = vpop.f32.mrb[12].mxu1 }
 0x3fd   :  { %v5328_v57 = vpop.f32.mrb[13].mxu0  ;;  %v5350_v43 = vpop.f32.mrb[13].mxu1 }
 0x3fe   :  { %v5329_v60 = vadd.f32 %v5328_v57, %v5327_v55  ;;  %v5330_v62 = vpop.f32.mrb[14].mxu0  ;;  %v5351_v63 = vadd.f32 %v5350_v43, %v5349_v56  ;;  %v5352_v58 = vpop.f32.mrb[14].mxu1 }
 0x3ff   :  { %v5331_v1 = vpop.f32.mrb[15].mxu0  ;;  %v5353_v19 = vpop.f32.mrb[15].mxu1 }
 0x400   :  { %v4620_v59 = vadd.f32 %v5329_v60, %v4580_v53 }
 0x402   :  { %v4660_v2 = vadd.f32 %v5351_v63, %v4620_v59 }
 0x404   :  { %v4665_v6 = vmax.f32 %v4660_v2, 0.0 }
 0x406   :  { %v4666_v8 = vmul.f32 %v4665_v6, %v89_v5 }
 0x408   :  { %4667 = vadd.xlane.f32.xlu0 %v4666_v8 }
 0x495   :  { %v4668_v54 = vpop.xlane.xlu0 %4667 }
 0x496   :  { %v4675_v12 = vadd.f32 %v4673_v11, %v4668_v54 }
 0x498   :  { %v4676_v13 = vsub.f32 0.0, %v4675_v12 }
 0x49a   :  { %v4677_v15 = vmul.f32 1.442695, %v4676_v13 }
 0x49c   :  { %5483 = vpow2.f32 %v4677_v15 }
 0x4a6   :  { %v5484_v16 = vpop.eup %5483 }
 0x4a7   :  { %v4679_v17 = vadd.f32 1.0, %v5484_v16 }
 0x4a9   :  { %5485 = vrcp.f32 %v4679_v17 }
 0x4b3   :  { %v5486_v18 = vpop.eup %5485 }
 0x4b4   :  { %4683 = vst.msk [vmem:[%s5810_s4] sm:$0xff] %vm4682_vm0, %v5486_v18 }
 0x4b5   :  { %4688 = vsyncpa [#allocation3], 1 }
 0x4b6   :  { %4689 = vsyncpa [#allocation5], 1 }
 0x4b7   :  { %4690 = vsyncpa [#allocation8], 1 }

</bundles_post_ra>
